<compile_context>
chip_gen: v7x
topology: tpu7x:2x2x1
jax: 0.10.0
libtpu: 0.0.40
codegen_flags: <defaults>
</compile_context>

<pallas_src>
import functools

import jax
import jax.numpy as jnp
from jax.experimental import pallas as pl
from jax.experimental.pallas import tpu as pltpu

COMMITMENT_COST = 0.25
NUM_RESIDUAL_QUANTIZERS = 3


def rvq_kernel(x_ref, cb_ref, half_esq_ref, quant_ref, enc_ref, stats_ref, *,
               n_rows, use_bf16_matmul):
    """One N-tile of the residual VQ forward pass.

    x_ref:        (TILE_N, D)       input rows
    cb_ref:       (R+1, K_pad, D)   stacked codebooks (VMEM-resident)
    half_esq_ref: (R+1, K_pad)      0.5*||e||^2 per codeword (1e30 for padding)
    quant_ref:    (TILE_N, D)       quantized output rows (f32)
    enc_ref:      (TILE_N, K_pad)   last-stage one-hot encodings (bf16)
    stats_ref:    (1, 8, K_pad)     row 0: codeword counts, [1, 0]: sum sq err
    """
    tile_n, d = x_ref.shape
    k_pad = enc_ref.shape[1]
    num_stages = cb_ref.shape[0]

    x = x_ref[...]
    half_esq = half_esq_ref[...]                                   # (R+1, K_pad)

    ragged = (n_rows % tile_n) != 0
    if ragged:
        t = pl.program_id(0)
        row_ids = t * tile_n + jax.lax.broadcasted_iota(jnp.int32, (tile_n, 1), 0)
        valid = row_ids < n_rows                                   # (TILE_N, 1)
        x = jnp.where(valid, x, 0.0)                               # zero junk rows once

    # Hoisted: lane iota reused by every stage's one-hot construction.
    lane_iota = jax.lax.broadcasted_iota(jnp.int32, (tile_n, k_pad), 1)

    quantized = jnp.zeros((tile_n, d), jnp.float32)
    counts = jnp.zeros((1, k_pad), jnp.float32)
    rsq = jnp.sum(x * x, axis=1, keepdims=True)                    # ||r_0||^2 per row
    sq_err = jnp.float32(0.0)
    enc = None

    for s in range(num_stages):                                    # unrolled (R+1 stages)
        codebook = cb_ref[s]                                       # (K_pad, D)
        residual = x - quantized
        if use_bf16_matmul:
            lhs = residual.astype(jnp.bfloat16)
            rhs = codebook.astype(jnp.bfloat16)
        else:
            lhs, rhs = residual, codebook
        # argmin ||r - e||^2 == argmin (0.5||e||^2 - r.e); the per-row ||r||^2
        # term is constant across codewords and the 2x is folded into half_esq.
        cross = jax.lax.dot_general(
            lhs, rhs, (((1,), (1,)), ((), ())),
            preferred_element_type=jnp.float32)                    # (TILE_N, K_pad)
        dist = half_esq[s:s + 1, :] - cross
        idx = jnp.argmin(dist, axis=1)                             # (TILE_N,)
        min_dist = jnp.min(dist, axis=1, keepdims=True)            # (TILE_N, 1)
        one_hot = lane_iota == idx[:, None]
        if ragged:
            one_hot = jnp.logical_and(one_hot, valid)
        enc = one_hot.astype(jnp.float32)
        # Lookup stays f32 so quantized values match an f32 reference exactly
        # (enc is an exact one-hot, so the matmul is a pure row selection).
        q_s = jnp.dot(enc, codebook, preferred_element_type=jnp.float32)
        # ||q_s - r||^2 per row = ||r||^2 + 2*min(dist); also = ||r_{s+1}||^2.
        row_err = jnp.maximum(rsq + 2.0 * min_dist, 0.0)
        if ragged:
            row_err = jnp.where(valid, row_err, 0.0)
        sq_err = sq_err + jnp.sum(row_err)
        counts = counts + jnp.sum(enc, axis=0, keepdims=True)
        quantized = quantized + q_s
        rsq = row_err

    quant_ref[...] = quantized
    enc_ref[...] = enc.astype(enc_ref.dtype)                       # bf16, 0/1 exact

    row8 = jax.lax.broadcasted_iota(jnp.int32, (8, k_pad), 0)
    lane8 = jax.lax.broadcasted_iota(jnp.int32, (8, k_pad), 1)
    stats = jnp.where(row8 == 0, counts, 0.0)
    stats = jnp.where((row8 == 1) & (lane8 == 0), sq_err, stats)
    stats_ref[0] = stats


def residual_vector_quantize(inputs, embedding, residual_embeddings,
                             commitment_cost=COMMITMENT_COST, tile_n=1024,
                             use_bf16_matmul=False):
    """JAX wrapper mirroring ResidualVectorQuantizer.forward.

    inputs:               (..., D) float (e.g. (B, H, W, D) channels-last)
    embedding:            (K, D)
    residual_embeddings:  (R, K, D)
    returns (loss, quantized, perplexity, last_encodings)
    """
    input_shape = inputs.shape
    k, d = embedding.shape
    r = residual_embeddings.shape[0]
    flat = inputs.reshape(-1, d).astype(jnp.float32)
    n = flat.shape[0]

    # Lane-dense codebook axis: pad K to a multiple of 128. Padded codewords
    # get a huge half-squared-norm so they never win the argmin.
    # NOTE: K_pad=128 only half-fills the 256-wide MXU on v6e/v7x; large TILE_N
    # (and the bf16 flag) is what recovers rate for this K.
    k_pad = ((k + 127) // 128) * 128
    codebooks = jnp.concatenate(
        [embedding[None].astype(jnp.float32),
         residual_embeddings.astype(jnp.float32)], axis=0)          # (R+1, K, D)
    half_esq = 0.5 * jnp.sum(codebooks * codebooks, axis=2)         # exact /2
    if k_pad != k:
        codebooks = jnp.pad(codebooks, ((0, 0), (0, k_pad - k), (0, 0)))
        half_esq = jnp.pad(half_esq, ((0, 0), (0, k_pad - k)),
                           constant_values=1e30)

    # ---- tile / VMEM selection (generation-aware) ----
    tile_n = int(tile_n)
    tile_n = max(16, min(tile_n, ((n + 15) // 16) * 16))
    tile_n = (tile_n // 16) * 16

    def _vmem_bytes(t):
        io = 2 * (2 * t * d * 4 + t * k_pad * 2 + 8 * k_pad * 4)    # double-buffered tiles
        resident = 2 * (r + 1) * k_pad * (d + 1) * 4                # codebooks + half_esq
        temps = t * (2 * d + 3 * k_pad) * 4                         # live compute values
        return io + resident + temps

    try:
        vmem_cap = int(pltpu.get_tpu_info().vmem_capacity_bytes)
    except Exception:
        vmem_cap = 64 * 1024 * 1024                                 # v7x per-TC floor
    vmem_budget = (3 * vmem_cap) // 4
    while tile_n > 16 and _vmem_bytes(tile_n) > vmem_budget:
        tile_n = max(16, ((tile_n // 2) // 16) * 16)
    vmem_limit = int(min(vmem_budget,
                         max(32 * 1024 * 1024, (_vmem_bytes(tile_n) * 5) // 4)))

    num_tiles = pl.cdiv(n, tile_n)

    out_shape = (
        jax.ShapeDtypeStruct((n, d), jnp.float32),                  # quantized rows
        jax.ShapeDtypeStruct((n, k_pad), jnp.bfloat16),             # last-stage one-hot
        jax.ShapeDtypeStruct((num_tiles, 8, k_pad), jnp.float32),   # per-tile stats
    )
    in_specs = [
        pl.BlockSpec((tile_n, d), lambda i: (i, 0)),                # pipelined rows
        # TODO(synk): pipeline_mode=pl.Buffered(1) for these two resident inputs.
        pl.BlockSpec((r + 1, k_pad, d), lambda i: (0, 0, 0)),       # resident codebooks
        pl.BlockSpec((r + 1, k_pad), lambda i: (0, 0)),             # resident half ||e||^2
    ]
    out_specs = (
        pl.BlockSpec((tile_n, d), lambda i: (i, 0)),
        pl.BlockSpec((tile_n, k_pad), lambda i: (i, 0)),
        pl.BlockSpec((1, 8, k_pad), lambda i: (i, 0, 0)),
    )

    flops = 4 * n * (r + 1) * k_pad * d                             # distance + lookup matmuls
    bytes_accessed = (4 * 2 * n * d + 2 * n * k_pad
                      + 4 * (r + 1) * k_pad * (d + 1)
                      + 4 * num_tiles * 8 * k_pad)

    quant_flat, enc_pad, stats = pl.pallas_call(
        functools.partial(rvq_kernel, n_rows=n,
                          use_bf16_matmul=use_bf16_matmul),
        out_shape=out_shape,
        grid=(num_tiles,),
        in_specs=in_specs,
        out_specs=out_specs,
        compiler_params=pltpu.CompilerParams(
            dimension_semantics=("parallel",),
            vmem_limit_bytes=vmem_limit),
        cost_estimate=pl.CostEstimate(
            flops=flops, transcendentals=0, bytes_accessed=bytes_accessed),
    )(flat, codebooks, half_esq)

    # Tiny final reductions (global, nonlinear -> stay outside the kernel).
    counts = jnp.sum(stats[:, 0, :k], axis=0)                       # (K,)
    sq_err_total = jnp.sum(stats[:, 1, 0])
    loss = (1.0 + commitment_cost) * sq_err_total / (n * d)
    avg_probs = counts / ((r + 1) * n)
    perplexity = jnp.exp(-jnp.sum(avg_probs * jnp.log(avg_probs + 1e-10)))

    quantized = quant_flat.reshape(input_shape)
    encodings = enc_pad[:, :k].astype(jnp.float32)
    # Straight-through (inputs + (quantized - inputs).detach()) and the detach()
    # splits inside the loss only affect gradients; forward values are exactly
    # `quantized` and (1+cc)*sum of stage MSEs, so nothing extra is needed.
    return loss, quantized, perplexity, encodings


# ---------------------- pure-JAX reference (for sanity) ----------------------
def _reference(inputs, embedding, residual_embeddings, commitment_cost):
    shape = inputs.shape
    d = embedding.shape[1]
    flat = inputs.reshape(-1, d).astype(jnp.float32)
    hi = jax.lax.Precision.HIGHEST   # true-f32 dots so the reference is exact

    def quantize(v, cb):
        dist = (jnp.sum(v * v, axis=1, keepdims=True)
                + jnp.sum(cb * cb, axis=1)[None, :]
                - 2.0 * jax.lax.dot_general(v, cb, (((1,), (1,)), ((), ())),
                                            precision=hi,
                                            preferred_element_type=jnp.float32))
        idx = jnp.argmin(dist, axis=1)
        enc = jax.nn.one_hot(idx, cb.shape[0], dtype=jnp.float32)
        q = jnp.dot(enc, cb, precision=hi, preferred_element_type=jnp.float32)
        return enc, q

    enc, quantized = quantize(flat, embedding)
    loss = (1.0 + commitment_cost) * jnp.mean((quantized - flat) ** 2)
    all_enc = enc
    for i in range(residual_embeddings.shape[0]):
        resid = flat - quantized
        enc, qr = quantize(resid, residual_embeddings[i])
        quantized = quantized + qr
        all_enc = all_enc + enc
        loss = loss + (1.0 + commitment_cost) * jnp.mean((qr - resid) ** 2)
    avg = jnp.mean(all_enc / float(residual_embeddings.shape[0] + 1), axis=0)
    perp = jnp.exp(-jnp.sum(avg * jnp.log(avg + 1e-10)))
    return loss, quantized.reshape(shape), perp, enc


if __name__ == "__main__":
    # Shapes implied by the module: embedding_dim=256, num_embeddings=100,
    # channels-last (B, H, W, D) input so view(-1, embedding_dim) is a reshape.
    batch, height, width = 2, 8, 8
    embedding_dim = 256
    num_embeddings = 100
    num_stages = NUM_RESIDUAL_QUANTIZERS + 1

    key = jax.random.PRNGKey(0)
    k_cb, k_idx, k_noise = jax.random.split(key, 3)

    # Hierarchically scaled codebooks with inputs planted near a codeword at
    # every stage: argmin margins are >> any cross-compiler matmul-precision
    # difference, so the kernel/reference comparison is robust on all TPUs.
    scales = (0.5, 0.08, 0.012, 0.002)
    cb_keys = jax.random.split(k_cb, num_stages)
    all_cbs = jnp.stack([
        s * jax.random.uniform(kk, (num_embeddings, embedding_dim),
                               minval=-1.0, maxval=1.0, dtype=jnp.float32)
        for s, kk in zip(scales, cb_keys)])
    embedding = all_cbs[0]
    residual_embeddings = all_cbs[1:]

    n_rows = batch * height * width
    idx_keys = jax.random.split(k_idx, num_stages)
    planted = jnp.zeros((n_rows, embedding_dim), jnp.float32)
    for s in range(num_stages):
        ids = jax.random.randint(idx_keys[s], (n_rows,), 0, num_embeddings)
        planted = planted + all_cbs[s][ids]
    noise = 1e-4 * jax.random.normal(k_noise, (n_rows, embedding_dim),
                                     dtype=jnp.float32)
    x = (planted + noise).reshape(batch, height, width, embedding_dim)

    r_loss, r_quant, r_perp, r_enc = _reference(
        x, embedding, residual_embeddings, COMMITMENT_COST)

    # (1) f32 path, even tile split (2 tiles -> exercises the parallel grid).
    loss, quantized, perplexity, encodings = residual_vector_quantize(
        x, embedding, residual_embeddings, COMMITMENT_COST, tile_n=64)
    jax.block_until_ready((loss, quantized, perplexity, encodings))
    assert jnp.array_equal(encodings, r_enc)
    assert jnp.allclose(perplexity, r_perp, rtol=1e-4, atol=1e-4)
    assert jnp.allclose(loss, r_loss, rtol=2e-2, atol=1e-5)
    assert jnp.allclose(quantized, r_quant, rtol=1e-2, atol=2e-3)

    # (2) ragged path (n % tile_n != 0 -> in-kernel row-validity mask).
    loss2, quant2, perp2, enc2 = residual_vector_quantize(
        x, embedding, residual_embeddings, COMMITMENT_COST, tile_n=48)
    jax.block_until_ready((loss2, quant2, perp2, enc2))
    assert jnp.array_equal(enc2, r_enc)
    assert jnp.allclose(perp2, r_perp, rtol=1e-4, atol=1e-4)
    assert jnp.allclose(loss2, r_loss, rtol=2e-2, atol=1e-5)
    assert jnp.allclose(quant2, r_quant, rtol=1e-2, atol=2e-3)

    # (3) bf16 cross-term path (flagged; margins in this test keep argmin safe).
    loss3, quant3, perp3, enc3 = residual_vector_quantize(
        x, embedding, residual_embeddings, COMMITMENT_COST, tile_n=64,
        use_bf16_matmul=True)
    jax.block_until_ready((loss3, quant3, perp3, enc3))
    assert jnp.array_equal(enc3, r_enc)
    assert jnp.allclose(loss3, r_loss, rtol=1e-1, atol=1e-4)
    assert jnp.allclose(quant3, r_quant, rtol=1e-2, atol=2e-3)

    print("KERNEL_OK")
</pallas_src>

<mosaic_0001>
module attributes {stable_mosaic.version = 11 : i64} {
  func.func @rvq_kernel(%arg0: i32, %arg1: memref<64x256xf32, #tpu.memory_space<vmem>>, %arg2: memref<4x128x256xf32, #tpu.memory_space<vmem>>, %arg3: memref<4x128xf32, #tpu.memory_space<vmem>>, %arg4: memref<64x256xf32, #tpu.memory_space<vmem>>, %arg5: memref<64x128xbf16, #tpu.memory_space<vmem>>, %arg6: memref<1x8x128xf32, #tpu.memory_space<vmem>>) attributes {dimension_semantics = [#tpu.dimension_semantics<parallel>], iteration_bounds = array<i64: 2>, scalar_prefetch = 0 : i64, scratch_operands = 0 : i64, tpu.core_type = #tpu.core_type<tc>, window_params = [{transform_indices = @transform_0, window_bounds = array<i64: 64, 256>}, {pipeline_mode = #tpu.pipeline_mode<synchronous>, transform_indices = @transform_1, window_bounds = array<i64: 4, 128, 256>}, {pipeline_mode = #tpu.pipeline_mode<synchronous>, transform_indices = @transform_2, window_bounds = array<i64: 4, 128>}, {transform_indices = @transform_3, window_bounds = array<i64: 64, 256>}, {transform_indices = @transform_4, window_bounds = array<i64: 64, 128>}, {transform_indices = @transform_5, window_bounds = array<i64: 1, 8, 128>}]} {
    %c0 = arith.constant 0 : index
    %c0_0 = arith.constant 0 : index
    %0 = vector.load %arg1[%c0, %c0_0] : memref<64x256xf32, #tpu.memory_space<vmem>>, vector<64x256xf32>
    %c0_1 = arith.constant 0 : index
    %c0_2 = arith.constant 0 : index
    %1 = vector.load %arg3[%c0_1, %c0_2] : memref<4x128xf32, #tpu.memory_space<vmem>>, vector<4x128xf32>
    %2 = tpu.iota {dimensions = array<i32: 1>} : vector<64x128xi32>
    %cst = arith.constant 0.000000e+00 : f32
    %3 = vector.broadcast %cst : f32 to vector<64x256xf32>
    %cst_3 = arith.constant 0.000000e+00 : f32
    %4 = vector.broadcast %cst_3 : f32 to vector<1x128xf32>
    %5 = arith.mulf %0, %0 : vector<64x256xf32>
    %cst_4 = arith.constant dense<0.000000e+00> : vector<64xf32>
    %6 = vector.multi_reduction <add>, %5, %cst_4 [1] : vector<64x256xf32> to vector<64xf32>
    %7 = vector.shape_cast %6 : vector<64xf32> to vector<64x1xf32>
    %c0_5 = arith.constant 0 : index
    %c0_6 = arith.constant 0 : index
    %c0_7 = arith.constant 0 : index
    %8 = vector.load %arg2[%c0_5, %c0_6, %c0_7] : memref<4x128x256xf32, #tpu.memory_space<vmem>>, vector<1x128x256xf32>
    %9 = vector.shape_cast %8 : vector<1x128x256xf32> to vector<128x256xf32>
    %10 = arith.subf %0, %3 : vector<64x256xf32>
    %cst_8 = arith.constant dense<0.000000e+00> : vector<64x128xf32>
    %11 = tpu.matmul %10, %9, %cst_8 {dimension_numbers = #tpu.dot_dimension_numbers<[1], [1], [0], [0], [0, 0, 1, 0], [], []>} : vector<64x256xf32>, vector<128x256xf32>, vector<64x128xf32> -> vector<64x128xf32>
    %12 = vector.extract_strided_slice %1 {offsets = [0, 0], sizes = [1, 128], strides = [1, 1]} : vector<4x128xf32> to vector<1x128xf32>
    %13 = vector.broadcast %12 : vector<1x128xf32> to vector<64x128xf32>
    %14 = arith.subf %13, %11 : vector<64x128xf32>
    %15 = tpu.reduce_index %14 {axis = 1 : i32, kind = #tpu.reduction_kind<arg_min>} : vector<64x128xf32> -> vector<64xi32>
    %cst_9 = arith.constant dense<0x7F800000> : vector<64xf32>
    %16 = vector.multi_reduction <minimumf>, %14, %cst_9 [1] : vector<64x128xf32> to vector<64xf32>
    %17 = vector.shape_cast %16 : vector<64xf32> to vector<64x1xf32>
    %18 = vector.shape_cast %15 : vector<64xi32> to vector<64x1xi32>
    %19 = vector.broadcast %18 : vector<64x1xi32> to vector<64x128xi32>
    %20 = arith.cmpi eq, %2, %19 : vector<64x128xi32>
    %21 = arith.extui %20 : vector<64x128xi1> to vector<64x128xi32>
    %22 = arith.sitofp %21 : vector<64x128xi32> to vector<64x128xf32>
    %cst_10 = arith.constant dense<0.000000e+00> : vector<64x256xf32>
    %23 = tpu.matmul %22, %9, %cst_10 {dimension_numbers = #tpu.dot_dimension_numbers<[1], [0], [0], [1], [0, 0, 1, 1], [], []>} : vector<64x128xf32>, vector<128x256xf32>, vector<64x256xf32> -> vector<64x256xf32>
    %cst_11 = arith.constant 2.000000e+00 : f32
    %24 = vector.broadcast %cst_11 : f32 to vector<64x1xf32>
    %25 = arith.mulf %24, %17 : vector<64x1xf32>
    %26 = arith.addf %7, %25 : vector<64x1xf32>
    %cst_12 = arith.constant 0.000000e+00 : f32
    %27 = vector.broadcast %cst_12 : f32 to vector<64x1xf32>
    %28 = arith.maximumf %26, %27 : vector<64x1xf32>
    %29 = vector.shape_cast %28 : vector<64x1xf32> to vector<1x64x1xf32>
    %cst_13 = arith.constant dense<0.000000e+00> : vector<1xf32>
    %30 = vector.multi_reduction <add>, %29, %cst_13 [1, 2] : vector<1x64x1xf32> to vector<1xf32>
    %31 = vector.shape_cast %30 : vector<1xf32> to vector<1x1x1xf32>
    %32 = vector.extract %31[0, 0, 0] : f32 from vector<1x1x1xf32>
    %cst_14 = arith.constant 0.000000e+00 : f32
    %33 = arith.addf %cst_14, %32 : f32
    %cst_15 = arith.constant dense<0.000000e+00> : vector<128xf32>
    %34 = vector.multi_reduction <add>, %22, %cst_15 [0] : vector<64x128xf32> to vector<128xf32>
    %35 = vector.shape_cast %34 : vector<128xf32> to vector<1x128xf32>
    %36 = arith.addf %4, %35 : vector<1x128xf32>
    %37 = arith.addf %3, %23 : vector<64x256xf32>
    %c1 = arith.constant 1 : index
    %c0_16 = arith.constant 0 : index
    %c0_17 = arith.constant 0 : index
    %38 = vector.load %arg2[%c1, %c0_16, %c0_17] : memref<4x128x256xf32, #tpu.memory_space<vmem>>, vector<1x128x256xf32>
    %39 = vector.shape_cast %38 : vector<1x128x256xf32> to vector<128x256xf32>
    %40 = arith.subf %0, %37 : vector<64x256xf32>
    %cst_18 = arith.constant dense<0.000000e+00> : vector<64x128xf32>
    %41 = tpu.matmul %40, %39, %cst_18 {dimension_numbers = #tpu.dot_dimension_numbers<[1], [1], [0], [0], [0, 0, 1, 0], [], []>} : vector<64x256xf32>, vector<128x256xf32>, vector<64x128xf32> -> vector<64x128xf32>
    %42 = vector.extract_strided_slice %1 {offsets = [1, 0], sizes = [1, 128], strides = [1, 1]} : vector<4x128xf32> to vector<1x128xf32>
    %43 = vector.broadcast %42 : vector<1x128xf32> to vector<64x128xf32>
    %44 = arith.subf %43, %41 : vector<64x128xf32>
    %45 = tpu.reduce_index %44 {axis = 1 : i32, kind = #tpu.reduction_kind<arg_min>} : vector<64x128xf32> -> vector<64xi32>
    %cst_19 = arith.constant dense<0x7F800000> : vector<64xf32>
    %46 = vector.multi_reduction <minimumf>, %44, %cst_19 [1] : vector<64x128xf32> to vector<64xf32>
    %47 = vector.shape_cast %46 : vector<64xf32> to vector<64x1xf32>
    %48 = vector.shape_cast %45 : vector<64xi32> to vector<64x1xi32>
    %49 = vector.broadcast %48 : vector<64x1xi32> to vector<64x128xi32>
    %50 = arith.cmpi eq, %2, %49 : vector<64x128xi32>
    %51 = arith.extui %50 : vector<64x128xi1> to vector<64x128xi32>
    %52 = arith.sitofp %51 : vector<64x128xi32> to vector<64x128xf32>
    %cst_20 = arith.constant dense<0.000000e+00> : vector<64x256xf32>
    %53 = tpu.matmul %52, %39, %cst_20 {dimension_numbers = #tpu.dot_dimension_numbers<[1], [0], [0], [1], [0, 0, 1, 1], [], []>} : vector<64x128xf32>, vector<128x256xf32>, vector<64x256xf32> -> vector<64x256xf32>
    %cst_21 = arith.constant 2.000000e+00 : f32
    %54 = vector.broadcast %cst_21 : f32 to vector<64x1xf32>
    %55 = arith.mulf %54, %47 : vector<64x1xf32>
    %56 = arith.addf %28, %55 : vector<64x1xf32>
    %cst_22 = arith.constant 0.000000e+00 : f32
    %57 = vector.broadcast %cst_22 : f32 to vector<64x1xf32>
    %58 = arith.maximumf %56, %57 : vector<64x1xf32>
    %59 = vector.shape_cast %58 : vector<64x1xf32> to vector<1x64x1xf32>
    %cst_23 = arith.constant dense<0.000000e+00> : vector<1xf32>
    %60 = vector.multi_reduction <add>, %59, %cst_23 [1, 2] : vector<1x64x1xf32> to vector<1xf32>
    %61 = vector.shape_cast %60 : vector<1xf32> to vector<1x1x1xf32>
    %62 = vector.extract %61[0, 0, 0] : f32 from vector<1x1x1xf32>
    %63 = arith.addf %33, %62 : f32
    %cst_24 = arith.constant dense<0.000000e+00> : vector<128xf32>
    %64 = vector.multi_reduction <add>, %52, %cst_24 [0] : vector<64x128xf32> to vector<128xf32>
    %65 = vector.shape_cast %64 : vector<128xf32> to vector<1x128xf32>
    %66 = arith.addf %36, %65 : vector<1x128xf32>
    %67 = arith.addf %37, %53 : vector<64x256xf32>
    %c2 = arith.constant 2 : index
    %c0_25 = arith.constant 0 : index
    %c0_26 = arith.constant 0 : index
    %68 = vector.load %arg2[%c2, %c0_25, %c0_26] : memref<4x128x256xf32, #tpu.memory_space<vmem>>, vector<1x128x256xf32>
    %69 = vector.shape_cast %68 : vector<1x128x256xf32> to vector<128x256xf32>
    %70 = arith.subf %0, %67 : vector<64x256xf32>
    %cst_27 = arith.constant dense<0.000000e+00> : vector<64x128xf32>
    %71 = tpu.matmul %70, %69, %cst_27 {dimension_numbers = #tpu.dot_dimension_numbers<[1], [1], [0], [0], [0, 0, 1, 0], [], []>} : vector<64x256xf32>, vector<128x256xf32>, vector<64x128xf32> -> vector<64x128xf32>
    %72 = vector.extract_strided_slice %1 {offsets = [2, 0], sizes = [1, 128], strides = [1, 1]} : vector<4x128xf32> to vector<1x128xf32>
    %73 = vector.broadcast %72 : vector<1x128xf32> to vector<64x128xf32>
    %74 = arith.subf %73, %71 : vector<64x128xf32>
    %75 = tpu.reduce_index %74 {axis = 1 : i32, kind = #tpu.reduction_kind<arg_min>} : vector<64x128xf32> -> vector<64xi32>
    %cst_28 = arith.constant dense<0x7F800000> : vector<64xf32>
    %76 = vector.multi_reduction <minimumf>, %74, %cst_28 [1] : vector<64x128xf32> to vector<64xf32>
    %77 = vector.shape_cast %76 : vector<64xf32> to vector<64x1xf32>
    %78 = vector.shape_cast %75 : vector<64xi32> to vector<64x1xi32>
    %79 = vector.broadcast %78 : vector<64x1xi32> to vector<64x128xi32>
    %80 = arith.cmpi eq, %2, %79 : vector<64x128xi32>
    %81 = arith.extui %80 : vector<64x128xi1> to vector<64x128xi32>
    %82 = arith.sitofp %81 : vector<64x128xi32> to vector<64x128xf32>
    %cst_29 = arith.constant dense<0.000000e+00> : vector<64x256xf32>
    %83 = tpu.matmul %82, %69, %cst_29 {dimension_numbers = #tpu.dot_dimension_numbers<[1], [0], [0], [1], [0, 0, 1, 1], [], []>} : vector<64x128xf32>, vector<128x256xf32>, vector<64x256xf32> -> vector<64x256xf32>
    %cst_30 = arith.constant 2.000000e+00 : f32
    %84 = vector.broadcast %cst_30 : f32 to vector<64x1xf32>
    %85 = arith.mulf %84, %77 : vector<64x1xf32>
    %86 = arith.addf %58, %85 : vector<64x1xf32>
    %cst_31 = arith.constant 0.000000e+00 : f32
    %87 = vector.broadcast %cst_31 : f32 to vector<64x1xf32>
    %88 = arith.maximumf %86, %87 : vector<64x1xf32>
    %89 = vector.shape_cast %88 : vector<64x1xf32> to vector<1x64x1xf32>
    %cst_32 = arith.constant dense<0.000000e+00> : vector<1xf32>
    %90 = vector.multi_reduction <add>, %89, %cst_32 [1, 2] : vector<1x64x1xf32> to vector<1xf32>
    %91 = vector.shape_cast %90 : vector<1xf32> to vector<1x1x1xf32>
    %92 = vector.extract %91[0, 0, 0] : f32 from vector<1x1x1xf32>
    %93 = arith.addf %63, %92 : f32
    %cst_33 = arith.constant dense<0.000000e+00> : vector<128xf32>
    %94 = vector.multi_reduction <add>, %82, %cst_33 [0] : vector<64x128xf32> to vector<128xf32>
    %95 = vector.shape_cast %94 : vector<128xf32> to vector<1x128xf32>
    %96 = arith.addf %66, %95 : vector<1x128xf32>
    %97 = arith.addf %67, %83 : vector<64x256xf32>
    %c3 = arith.constant 3 : index
    %c0_34 = arith.constant 0 : index
    %c0_35 = arith.constant 0 : index
    %98 = vector.load %arg2[%c3, %c0_34, %c0_35] : memref<4x128x256xf32, #tpu.memory_space<vmem>>, vector<1x128x256xf32>
    %99 = vector.shape_cast %98 : vector<1x128x256xf32> to vector<128x256xf32>
    %100 = arith.subf %0, %97 : vector<64x256xf32>
    %cst_36 = arith.constant dense<0.000000e+00> : vector<64x128xf32>
    %101 = tpu.matmul %100, %99, %cst_36 {dimension_numbers = #tpu.dot_dimension_numbers<[1], [1], [0], [0], [0, 0, 1, 0], [], []>} : vector<64x256xf32>, vector<128x256xf32>, vector<64x128xf32> -> vector<64x128xf32>
    %102 = vector.extract_strided_slice %1 {offsets = [3, 0], sizes = [1, 128], strides = [1, 1]} : vector<4x128xf32> to vector<1x128xf32>
    %103 = vector.broadcast %102 : vector<1x128xf32> to vector<64x128xf32>
    %104 = arith.subf %103, %101 : vector<64x128xf32>
    %105 = tpu.reduce_index %104 {axis = 1 : i32, kind = #tpu.reduction_kind<arg_min>} : vector<64x128xf32> -> vector<64xi32>
    %cst_37 = arith.constant dense<0x7F800000> : vector<64xf32>
    %106 = vector.multi_reduction <minimumf>, %104, %cst_37 [1] : vector<64x128xf32> to vector<64xf32>
    %107 = vector.shape_cast %106 : vector<64xf32> to vector<64x1xf32>
    %108 = vector.shape_cast %105 : vector<64xi32> to vector<64x1xi32>
    %109 = vector.broadcast %108 : vector<64x1xi32> to vector<64x128xi32>
    %110 = arith.cmpi eq, %2, %109 : vector<64x128xi32>
    %111 = arith.extui %110 : vector<64x128xi1> to vector<64x128xi32>
    %112 = arith.sitofp %111 : vector<64x128xi32> to vector<64x128xf32>
    %cst_38 = arith.constant dense<0.000000e+00> : vector<64x256xf32>
    %113 = tpu.matmul %112, %99, %cst_38 {dimension_numbers = #tpu.dot_dimension_numbers<[1], [0], [0], [1], [0, 0, 1, 1], [], []>} : vector<64x128xf32>, vector<128x256xf32>, vector<64x256xf32> -> vector<64x256xf32>
    %cst_39 = arith.constant 2.000000e+00 : f32
    %114 = vector.broadcast %cst_39 : f32 to vector<64x1xf32>
    %115 = arith.mulf %114, %107 : vector<64x1xf32>
    %116 = arith.addf %88, %115 : vector<64x1xf32>
    %cst_40 = arith.constant 0.000000e+00 : f32
    %117 = vector.broadcast %cst_40 : f32 to vector<64x1xf32>
    %118 = arith.maximumf %116, %117 : vector<64x1xf32>
    %119 = vector.shape_cast %118 : vector<64x1xf32> to vector<1x64x1xf32>
    %cst_41 = arith.constant dense<0.000000e+00> : vector<1xf32>
    %120 = vector.multi_reduction <add>, %119, %cst_41 [1, 2] : vector<1x64x1xf32> to vector<1xf32>
    %121 = vector.shape_cast %120 : vector<1xf32> to vector<1x1x1xf32>
    %122 = vector.extract %121[0, 0, 0] : f32 from vector<1x1x1xf32>
    %123 = arith.addf %93, %122 : f32
    %cst_42 = arith.constant dense<0.000000e+00> : vector<128xf32>
    %124 = vector.multi_reduction <add>, %112, %cst_42 [0] : vector<64x128xf32> to vector<128xf32>
    %125 = vector.shape_cast %124 : vector<128xf32> to vector<1x128xf32>
    %126 = arith.addf %96, %125 : vector<1x128xf32>
    %127 = arith.addf %97, %113 : vector<64x256xf32>
    %c0_43 = arith.constant 0 : index
    %c0_44 = arith.constant 0 : index
    %128 = vector.load %arg4[%c0_43, %c0_44] : memref<64x256xf32, #tpu.memory_space<vmem>>, vector<64x256xf32>
    tpu.vector_store %arg4[%c0_43, %c0_44], %127 {strides = array<i32>} : memref<64x256xf32, #tpu.memory_space<vmem>>, vector<64x256xf32>,
    %129 = arith.truncf %112 : vector<64x128xf32> to vector<64x128xbf16>
    %c0_45 = arith.constant 0 : index
    %c0_46 = arith.constant 0 : index
    %130 = vector.load %arg5[%c0_45, %c0_46] : memref<64x128xbf16, #tpu.memory_space<vmem>>, vector<64x128xbf16>
    tpu.vector_store %arg5[%c0_45, %c0_46], %129 {strides = array<i32>} : memref<64x128xbf16, #tpu.memory_space<vmem>>, vector<64x128xbf16>,
    %131 = tpu.iota {dimensions = array<i32: 0>} : vector<8x128xi32>
    %132 = tpu.iota {dimensions = array<i32: 1>} : vector<8x128xi32>
    %c0_i32 = arith.constant 0 : i32
    %133 = vector.broadcast %c0_i32 : i32 to vector<8x128xi32>
    %134 = arith.cmpi eq, %131, %133 : vector<8x128xi32>
    %cst_47 = arith.constant 0.000000e+00 : f32
    %135 = vector.shape_cast %126 : vector<1x128xf32> to vector<1x128xf32>
    %136 = vector.broadcast %135 : vector<1x128xf32> to vector<8x128xf32>
    %137 = vector.broadcast %cst_47 : f32 to vector<8x128xf32>
    %138 = arith.select %134, %136, %137 : vector<8x128xi1>, vector<8x128xf32>
    %c1_i32 = arith.constant 1 : i32
    %139 = vector.broadcast %c1_i32 : i32 to vector<8x128xi32>
    %140 = arith.cmpi eq, %131, %139 : vector<8x128xi32>
    %c0_i32_48 = arith.constant 0 : i32
    %141 = vector.broadcast %c0_i32_48 : i32 to vector<8x128xi32>
    %142 = arith.cmpi eq, %132, %141 : vector<8x128xi32>
    %143 = arith.andi %140, %142 : vector<8x128xi1>
    %144 = vector.broadcast %123 : f32 to vector<8x128xf32>
    %145 = arith.select %143, %144, %138 : vector<8x128xi1>, vector<8x128xf32>
    %c0_49 = arith.constant 0 : index
    %c0_50 = arith.constant 0 : index
    %c0_51 = arith.constant 0 : index
    %146 = vector.load %arg6[%c0_49, %c0_50, %c0_51] : memref<1x8x128xf32, #tpu.memory_space<vmem>>, vector<1x8x128xf32>
    %147 = vector.shape_cast %146 : vector<1x8x128xf32> to vector<8x128xf32>
    %148 = vector.shape_cast %145 : vector<8x128xf32> to vector<1x8x128xf32>
    tpu.vector_store %arg6[%c0_49, %c0_50, %c0_51], %148 {strides = array<i32>} : memref<1x8x128xf32, #tpu.memory_space<vmem>>, vector<1x8x128xf32>,
    return
  }
  func.func @transform_0(%arg0: i32) -> (i32, i32) {
    %c0_i32 = arith.constant 0 : i32
    %c0_i32_0 = arith.constant 0 : i32
    return %arg0, %c0_i32 : i32, i32
  }
  func.func @transform_1(%arg0: i32) -> (i32, i32, i32) {
    %c0_i32 = arith.constant 0 : i32
    %c0_i32_0 = arith.constant 0 : i32
    %c0_i32_1 = arith.constant 0 : i32
    %c0_i32_2 = arith.constant 0 : i32
    return %c0_i32, %c0_i32_0, %c0_i32_1 : i32, i32, i32
  }
  func.func @transform_2(%arg0: i32) -> (i32, i32) {
    %c0_i32 = arith.constant 0 : i32
    %c0_i32_0 = arith.constant 0 : i32
    %c0_i32_1 = arith.constant 0 : i32
    return %c0_i32, %c0_i32_0 : i32, i32
  }
  func.func @transform_3(%arg0: i32) -> (i32, i32) {
    %c0_i32 = arith.constant 0 : i32
    %c0_i32_0 = arith.constant 0 : i32
    return %arg0, %c0_i32 : i32, i32
  }
  func.func @transform_4(%arg0: i32) -> (i32, i32) {
    %c0_i32 = arith.constant 0 : i32
    %c0_i32_0 = arith.constant 0 : i32
    return %arg0, %c0_i32 : i32, i32
  }
  func.func @transform_5(%arg0: i32) -> (i32, i32, i32) {
    %c0_i32 = arith.constant 0 : i32
    %c0_i32_0 = arith.constant 0 : i32
    %c0_i32_1 = arith.constant 0 : i32
    return %arg0, %c0_i32, %c0_i32_0 : i32, i32, i32
  }
}

</mosaic_0001>

<bundles_post_ra>
// kernel: tpu_custom_call.1
= control target key start
LH: loop header
LB: loop body
LE: loop exit
PB: predicated region body
PF: predicated region fallthrough
CT: control target
= control target key end

     0   :  { %11 = vsyncpa [#allocation3], 0  ;;  %s4098_s0 = inlined_call_operand.hbm [shape: f32[128,256], index: 0, kind: input, shape index: {}]   ;;  %s4099_s1 = inlined_call_operand.hbm [shape: f32[4,128,256], index: 1, kind: input, shape index: {}]   ;;  %s4100_s2 = inlined_call_operand.vmem [shape: f32[4,128], index: 2, kind: input, shape index: {}]   ;;  %s4101_s3 = inlined_call_operand.hbm [shape: f32[128,256], index: 3, kind: output, shape index: {0}]   ;;  %s4102_s4 = inlined_call_operand.hbm [shape: bf16[128,128], index: 4, kind: output, shape index: {1}]   ;;  %s4103_s5 = inlined_call_operand.hbm [shape: f32[2,8,128], index: 5, kind: output, shape index: {2}]  }
   0x1   :  { %13 = vsyncpa [#allocation3 + $0x1], 0 }
   0x2   :  { %14 = vsyncpa [#allocation6], 0 }
   0x3   :  { %15 = vsyncpa [#allocation4], 0 }
   0x4   :  { %17 = vsyncpa [#allocation4 + $0x1], 0 }
   0x5   :  { %18 = vsyncpa [#allocation9], 0 }
   0x6   :  { %20 = vsyncpa [#allocation9 + $0x1], 0  ;;  %s2941_s18 = smov 0   ;;  %s2943_s19 = smov 0  }
   0x7   :  { %s2945_s20 = smov 0   ;;  %s2947_s21 = smov 0  }
   0x8 LB: > { %s2962_s22 = sadd.s32 4294967295, %s2896_s21   ;;  %s2227_s23 = sadd.s32 4294967294, %s2896_s21   ;;  %s2896_s21 = sphi %s2947_s21, %s4165_s21   ;;  %s2892_s20 = sphi %s2945_s20, %s4164_s20   ;;  %s2888_s19 = sphi %s2943_s19, %s4163_s19   ;;  %s2884_s18 = sphi %s2941_s18, %s4162_s18  }
   0x9   : > { %p46_p0 = scmp.ne.s32.totalorder %s2888_s19, %s2884_s18  ;;  %p4104_p1 = scmp.eq.s32.totalorder %s2962_s22, 0 }
   0xa   : > { %p118_p3 = scmp.eq.s32.totalorder %s2227_s23, 1  ;;  %p2228_p5 = scmp.ge.s32.totalorder %s2896_s21, 1 }
   0xb   : > { %p2973_p4 = por %p4104_p1, %p46_p0  ;;  %p177_p7 = scmp.lt.s32.totalorder %s2896_s21, 3 }
   0xc   : > { %p2978_p6 = por %p118_p3, %p46_p0  ;;  %s2898_s27 = smov [#allocation5]  }
   0xd   : > { %s4123_s24 = scalar_select %p2973_p4, 1, 0 }
   0xe   : > { %s4124_s25 = scalar_select %p2978_p6, 1, 0 }
   0xf   : > { %p2983_p8 = pnand %p2228_p5, %p177_p7  ;;  %s189_s28 = sshll.u32 %s2898_s27, 4  ;;  %s2987_s28 = int_to_ptr.vmem [resolvable:$true] %s189_s28 }
  0x10   : > { %s2999_s30 = sadd.s32 1, %s2896_s21   ;;  %s33_s6 = sadd.s32 1, %s2892_s20 }
  0x11   : > { %s4125_s26 = scalar_select %p2983_p8, 1, 0 }
  0x12   : > { %p2628_p9 = pneg %p2983_p8  ;;  %s30_s7 = ssub.s32 %s2896_s21, %s2999_s30 }
  0x13   : > { %s2708_s10 = scalar_lea.hbm %s4099_s1, 16384 }
  0x14   : > { %p2994_p11 = pnand %p2628_p9, %p4104_p1  ;;  %p2709_p12 = scmp.ne.s32.totalorder %s4099_s1, %s2708_s10 }
  0x15   : > { %p2715_p5 = scmp.lt.u32.totalorder %s2708_s10, %s4099_s1 }
  0x16   : > { %p2710_p13 = pneg %p2994_p11 }
  0x18   : > { %p2711_p0 = pnand %p2710_p13, %p2709_p12 }
  0x1a   : > { %p2712_p3 = pneg %p2711_p0 }
  0x1c   : > { %p2717_p7 = pnand %p2715_p5, %p2712_p3 }
  0x1e   : > { %2720 = shalt.err (!%p2717_p7)
}
  0x1f   : > { %s2721_s15 = scalar_lea.vmem %s2987_s28, 16384  ;;  %p2729_p2 = scmp.lt.s32.totalorder %s2987_s28, %s2987_s28 }
  0x20   : > { %p2722_p9 = scmp.ne.s32.totalorder %s2987_s28, %s2721_s15  ;;  %p2730_p6 = scmp.lt.s32.totalorder %s2721_s15, %s2721_s15 }
  0x22   : > { %p2724_p10 = pnand %p2722_p9, %p2710_p13  ;;  %p2731_p4 = por %p2730_p6, %p2729_p2 }
  0x24   : > { %p2725_p1 = pneg %p2724_p10 }
  0x26   : > { %p2732_p8 = pnand %p2731_p4, %p2725_p1 }
  0x28   : > { %2735 = shalt.err (!%p2732_p8)
}
  0x29   : > { %s2899_s16 = smov 256   ;;  %s2900_s17 = smov 16  }
  0x2a   : > { %2631 = dma.hbm_to_vmem [thread:$0]  (!%p2994_p11), %s4099_s1, 16384, %s2987_s28, [#allocation6], %s2899_s16, %s2899_s16, %s2900_s17  }
  0x2b   : > { %p31_p1 = scmp.eq.s32.totalorder %s30_s7, 0  ;;  %p40_p2 = scmp.ne.s32.totalorder %s2892_s20, %s2888_s19 }
  0x2c   : > { %p41_p4 = scmp.eq.s32.totalorder %s2896_s21, 0  ;;  %p2647_p6 = scmp.lt.s32.totalorder %s2896_s21, 2 }
  0x2d   : > { %s3033_s9 = scalar_select %p31_p1, %s2892_s20, %s33_s6  }
  0x2e   : > { %p42_p8 = por %p41_p4, %p40_p2  ;;  %p4127_p10 = scmp.eq.s32.totalorder %s2962_s22, 1 }
  0x2f   : > { %s206_s29 = sand.u32 1, %s2892_s20   ;;  %s2325_s11 = sshll.u32 %s2896_s21, 11 }
  0x30   : > { %p3037_p12 = por %p4127_p10, %p40_p2  ;;  %s2231_s12 = sshll.u32 %s206_s29, 7 }
  0x31   : > { %s3046_s15 = scalar_lea.hbm %s4098_s0, %s2325_s11  ;;  %s210_s28 = scalar_lea.vmem [#allocation2], %s2231_s12 }
  0x32   : > { %s218_s6 = sshll.u32 %s210_s28, 4  ;;  %p3048_p11 = pnand %p2647_p6, %p42_p8  ;;  %s3052_s6 = int_to_ptr.vmem [resolvable:$true] %s218_s6 }
  0x33   : > { %s3054_s27 = scalar_lea.sflag [#allocation3], %s206_s29  ;;  %s2736_s8 = scalar_lea.hbm %s3046_s15, 2048 }
  0x34   : > { %p2737_p13 = scmp.ne.s32.totalorder %s3046_s15, %s2736_s8  ;;  %p2738_p0 = pneg %p3048_p11 }
  0x35   : > { %s2741_s13 = scalar_lea.hbm %s4098_s0, 4096  ;;  %p2742_p7 = scmp.lt.u32.totalorder %s3046_s15, %s4098_s0 }
  0x36   : > { %p2739_p3 = pnand %p2738_p0, %p2737_p13  ;;  %p2743_p9 = scmp.lt.u32.totalorder %s2741_s13, %s2736_s8 }
  0x37   : > { %p2745_p2 = scmp.lt.u32.totalorder %s2736_s8, %s3046_s15 }
  0x38   : > { %p2740_p5 = pneg %p2739_p3  ;;  %p2744_p1 = por %p2743_p9, %p2742_p7 }
  0x3a   : > { %p2746_p4 = por %p2745_p2, %p2744_p1 }
  0x3c   : > { %p2747_p6 = pnand %p2746_p4, %p2740_p5 }
  0x3e   : > { %2750 = shalt.err (!%p2747_p6)
}
  0x3f   : > { %s2751_s29 = scalar_lea.vmem %s3052_s6, 2048  ;;  %s2901_s11 = smov [#allocation2]  }
  0x40   : > { %p2752_p8 = scmp.ne.s32.totalorder %s3052_s6, %s2751_s29  ;;  %s2756_s12 = sshll.u32 %s2901_s11, 4  ;;  %s2757_s12 = int_to_ptr.vmem [resolvable:$false] %s2756_s12 }
  0x41   : > { %s2758_s14 = scalar_lea.vmem %s2757_s12, 4096  ;;  %p2759_p3 = scmp.lt.s32.totalorder %s3052_s6, %s2757_s12 }
  0x42   : > { %p2754_p10 = pnand %p2752_p8, %p2738_p0  ;;  %p2760_p7 = scmp.lt.s32.totalorder %s2758_s14, %s2751_s29 }
  0x44   : > { %p2755_p13 = pneg %p2754_p10  ;;  %p2761_p9 = por %p2760_p7, %p2759_p3 }
  0x46   : > { %p2762_p1 = pnand %p2761_p9, %p2755_p13 }
  0x48   : > { %2765 = shalt.err (!%p2762_p1)
}
  0x49   : > { %2635 = dma.hbm_to_vmem [thread:$0]  (!%p3048_p11), %s3046_s15, 2048, %s3052_s6, %s3054_s27, %s2899_s16, %s2899_s16, %s2900_s17  }
  0x4a   : > { %p4130_p0 = scmp.ne.s32.totalorder %s4125_s26, 0 }
  0x4c   : > { %230 = sbr.rel (%p4130_p0) target bundleno = 2575 (0xa0f), region = 32 }
  0x53   : > { %s3088_s8 = sand.u32 1, %s2888_s19   ;;  %p4131_p5 = scmp.ne.s32.totalorder %s4123_s24, 0 }
  0x54   : > { %s2236_s13 = sshll.u32 %s3088_s8, 7  ;;  %s233_s28 = scalar_lea.sflag [#allocation3], %s3088_s8 }
  0x55   : > { %s3094_s7 = scalar_lea.vmem [#allocation2], %s2236_s13 }
  0x56   : > { %2867 = dma.done.wait (%p4131_p5), %s233_s28, 2048  }
  0x57   : > { %2869 = vsyncadd (%p4131_p5), %s233_s28, 4294965248  ;;  %p4132_p11 = scmp.eq.s32.totalorder %s2962_s22, 0 }
  0x59   : > { %2871 = dma.done.wait (%p4132_p11), [#allocation6], 16384   ;;  %p4133_p2 = pmov %p4132_p11 }
  0x5a   : > { %v340_v0 = vld [vmem:[#allocation5 + $0x8] sm:$0xff]  ;;  %v342_v1 = vld [vmem:[#allocation5 + $0x18] sm:$0xff]  ;;  %v339_v2 = vld [vmem:[#allocation5] sm:$0xff]  ;;  %s2239_s15 = sshll.u32 %s3088_s8, 5  ;;  %s2034_s29 = sand.u32 1, %s2962_s22  }
  0x5b   : > { %2873 = vsyncadd (%p4133_p2), [#allocation6], 4294950912  ;;  %v2352_v3 = vpack.c.bf16 %v342_v1, %v340_v0  ;;  %v341_v4 = vld [vmem:[#allocation5 + $0x10] sm:$0xff]  ;;  %v344_v5 = vld [vmem:[#allocation5 + $0x28] sm:$0xff]  ;;  %v4107_v0 = vmov 0.0   ;;  %v297_v1 = vlaneseq  ;;  %s3876_s6 = scalar_lea.vmem [#allocation8], %s2239_s15 }
  0x5c   : > { %v346_v6 = vld [vmem:[#allocation5 + $0x38] sm:$0xff]  ;;  %v2354_v7 = vpack.c.bf16 %v341_v4, %v339_v2  ;;  %v343_v9 = vld [vmem:[#allocation5 + $0x20] sm:$0xff]  ;;  %v345_v10 = vld [vmem:[#allocation5 + $0x30] sm:$0xff]  ;;  %672 = vmatprep.mubr.f32.mxu1 %v4107_v0  ;;  %s2070_s27 = sshll.u32 %s3876_s6, 4  ;;  %s2336_s11 = sshll.u32 %s2962_s22, 9  ;;  %s3941_s27 = int_to_ptr.vmem [resolvable:$true] %s2070_s27 }
  0x5d   : > { %v2356_v8 = vpack.c.bf16 %v346_v6, %v344_v5  ;;  %2353 = vmatprep.subr.bf16.mxu0 %v2352_v3  ;;  %2385 = vmatprep.subr.bf16.mxu1 %v2352_v3  ;;  %v348_v11 = vld [vmem:[#allocation5 + $0x48] sm:$0xff]  ;;  %v350_v12 = vld [vmem:[#allocation5 + $0x58] sm:$0xff]  ;;  %v2358_v13 = vpack.c.bf16 %v345_v10, %v343_v9  ;;  %v347_v15 = vld [vmem:[#allocation5 + $0x40] sm:$0xff]  ;;  %v3171_v2 = vshrl.u32 %v297_v1, 7  ;;  %s3948_s28 = scalar_lea.hbm %s4102_s4, %s2336_s11  ;;  %s2766_s24 = scalar_lea.vmem %s3941_s27, 512 }
  0x5e   : > { %2355 = vmatpush1.bf16.xpose.msra.mxu0 %v2354_v7  ;;  %2387 = vmatpush1.bf16.msra.mxu1 %v2354_v7  ;;  %v2360_v14 = vpack.c.bf16 %v350_v12, %v348_v11  ;;  %v349_v16 = vld [vmem:[#allocation5 + $0x50] sm:$0xff]  ;;  %v352_v17 = vld [vmem:[#allocation5 + $0x68] sm:$0xff]  ;;  %v354_v18 = vld [vmem:[#allocation5 + $0x78] sm:$0xff]  ;;  %p2767_p4 = scmp.ne.s32.totalorder %s3941_s27, %s2766_s24  ;;  %s2904_s26 = smov [#allocation8]  }
  0x5f   : > { %2357 = vmatprep.subr.bf16.mxu0 %v2356_v8  ;;  %2389 = vmatprep.subr.bf16.mxu1 %v2356_v8  ;;  %v2362_v19 = vpack.c.bf16 %v349_v16, %v347_v15  ;;  %v3105_v20 = vld [vmem:[%s3094_s7 + $0x8] sm:$0xff]  ;;  %v2364_v21 = vpack.c.bf16 %v354_v18, %v352_v17  ;;  %v351_v22 = vld [vmem:[#allocation5 + $0x60] sm:$0xff]  ;;  %v353_v23 = vld [vmem:[#allocation5 + $0x70] sm:$0xff]  ;;  %v478_v3 = vsub.s32 0, %v3171_v2  ;;  %s2770_s16 = sshll.u32 %s2904_s26, 4  ;;  %s2771_s16 = int_to_ptr.vmem [resolvable:$false] %s2770_s16 }
  0x60   : > { %435 = vmatprep.mubr.f32.mxu0 %v3105_v20  ;;  %v356_v24 = vld [vmem:[#allocation5 + $0x88] sm:$0xff]  ;;  %v358_v25 = vld [vmem:[#allocation5 + $0x98] sm:$0xff]  ;;  %v2366_v26 = vpack.c.bf16 %v353_v23, %v351_v22  ;;  %v355_v28 = vld [vmem:[#allocation5 + $0x80] sm:$0xff]  ;;  %p2768_p6 = pnand %p2767_p4, %p3037_p12  ;;  %s2772_s17 = scalar_lea.vmem %s2771_s16, 1024 }
  0x61   : > { %v2368_v27 = vpack.c.bf16 %v358_v25, %v356_v24  ;;  %v357_v29 = vld [vmem:[#allocation5 + $0x90] sm:$0xff]  ;;  %v360_v30 = vld [vmem:[#allocation5 + $0xa8] sm:$0xff]  ;;  %v362_v31 = vld [vmem:[#allocation5 + $0xb8] sm:$0xff]  ;;  %p2773_p10 = scmp.lt.s32.totalorder %s3941_s27, %s2771_s16  ;;  %p2774_p13 = scmp.lt.s32.totalorder %s2772_s17, %s2766_s24 }
  0x62   : > { %2391 = vmatpush1.bf16.msra.mxu1 %v2358_v13  ;;  %v2370_v32 = vpack.c.bf16 %v357_v29, %v355_v28  ;;  %v2372_v33 = vpack.c.bf16 %v362_v31, %v360_v30  ;;  %v359_v34 = vld [vmem:[#allocation5 + $0xa0] sm:$0xff]  ;;  %v361_v35 = vld [vmem:[#allocation5 + $0xb0] sm:$0xff]  ;;  %v364_v36 = vld [vmem:[#allocation5 + $0xc8] sm:$0xff]  ;;  %p2769_p8 = pneg %p2768_p6 }
  0x63   : > { %2393 = vmatprep.subr.bf16.mxu1 %v2360_v14  ;;  %v366_v37 = vld [vmem:[#allocation5 + $0xd8] sm:$0xff]  ;;  %v2374_v38 = vpack.c.bf16 %v361_v35, %v359_v34  ;;  %v363_v40 = vld [vmem:[#allocation5 + $0xc0] sm:$0xff]  ;;  %v365_v41 = vld [vmem:[#allocation5 + $0xd0] sm:$0xff]  ;;  %p2775_p3 = por %p2774_p13, %p2773_p10 }
  0x64   : > { %v2376_v39 = vpack.c.bf16 %v366_v37, %v364_v36  ;;  %v368_v42 = vld [vmem:[#allocation5 + $0xe8] sm:$0xff]  ;;  %v370_v43 = vld [vmem:[#allocation5 + $0xf8] sm:$0xff]  ;;  %v2378_v44 = vpack.c.bf16 %v365_v41, %v363_v40  ;;  %v367_v46 = vld [vmem:[#allocation5 + $0xe0] sm:$0xff] }
  0x65   : > { %v2380_v45 = vpack.c.bf16 %v370_v43, %v368_v42  ;;  %v369_v47 = vld [vmem:[#allocation5 + $0xf0] sm:$0xff]  ;;  %v3109_v49 = vld [vmem:[%s3094_s7] sm:$0xff]  ;;  %v3112_v50 = vld [vmem:[%s3094_s7 + $0x18] sm:$0xff]  ;;  %p2776_p7 = pnand %p2775_p3, %p2769_p8 }
  0x66   : > { %2359 = vmatpush1.bf16.xpose.msra.mxu0 %v2358_v13  ;;  %2395 = vmatpush1.bf16.msra.mxu1 %v2362_v19  ;;  %v2382_v48 = vpack.c.bf16 %v369_v47, %v367_v46  ;;  %v3117_v51 = vld [vmem:[%s3094_s7 + $0x10] sm:$0xff]  ;;  %v3120_v52 = vld [vmem:[%s3094_s7 + $0x28] sm:$0xff]  ;;  %v3125_v53 = vld [vmem:[%s3094_s7 + $0x20] sm:$0xff] }
  0x67   : > { %2361 = vmatprep.subr.bf16.mxu0 %v2360_v14  ;;  %2397 = vmatprep.subr.bf16.mxu1 %v2364_v21  ;;  %v3128_v54 = vld [vmem:[%s3094_s7 + $0x38] sm:$0xff]  ;;  %v3133_v55 = vld [vmem:[%s3094_s7 + $0x30] sm:$0xff]  ;;  %v3136_v56 = vld [vmem:[%s3094_s7 + $0x48] sm:$0xff] }
  0x68   : > { %v3141_v57 = vld [vmem:[%s3094_s7 + $0x40] sm:$0xff]  ;;  %v3144_v58 = vld [vmem:[%s3094_s7 + $0x58] sm:$0xff]  ;;  %v3149_v59 = vld [vmem:[%s3094_s7 + $0x50] sm:$0xff] }
  0x69   : > { %v3152_v60 = vld [vmem:[%s3094_s7 + $0x68] sm:$0xff]  ;;  %v3157_v61 = vld [vmem:[%s3094_s7 + $0x60] sm:$0xff]  ;;  %v3160_v62 = vld [vmem:[%s3094_s7 + $0x78] sm:$0xff] }
  0x6a   : > { %2399 = vmatpush1.bf16.msra.mxu1 %v2366_v26  ;;  %v3165_v63 = vld [vmem:[%s3094_s7 + $0x70] sm:$0xff]  ;;  %v3177_v4 = vld [vmem:[%s4100_s2] sm:$0xf]  ;;  %v723_v31 = vld [vmem:[#allocation5 + $0x108] sm:$0xff] }
  0x6b   : > { %2401 = vmatprep.subr.bf16.mxu1 %v2368_v27  ;;  %v479_v5 = vrot.slane %v3177_v4, %v478_v3  ;;  %v724_v35 = vld [vmem:[#allocation5 + $0x110] sm:$0xff]  ;;  %v727_v36 = vld [vmem:[#allocation5 + $0x128] sm:$0xff]  ;;  %v729_v37 = vld [vmem:[#allocation5 + $0x138] sm:$0xff] }
  0x6c   : > { %v726_v40 = vld [vmem:[#allocation5 + $0x120] sm:$0xff]  ;;  %v728_v41 = vld [vmem:[#allocation5 + $0x130] sm:$0xff]  ;;  %v731_v42 = vld [vmem:[#allocation5 + $0x148] sm:$0xff] }
  0x6d   : > { %v733_v43 = vld [vmem:[#allocation5 + $0x158] sm:$0xff]  ;;  %v730_v46 = vld [vmem:[#allocation5 + $0x140] sm:$0xff]  ;;  %v732_v47 = vld [vmem:[#allocation5 + $0x150] sm:$0xff] }
  0x6e   : > { %2363 = vmatpush1.bf16.xpose.msra.mxu0 %v2362_v19  ;;  %2403 = vmatpush1.bf16.msra.mxu1 %v2370_v32  ;;  %v737_v3 = vld [vmem:[#allocation5 + $0x178] sm:$0xff] }
  0x6f   : > { %2365 = vmatprep.subr.bf16.mxu0 %v2364_v21  ;;  %2405 = vmatprep.subr.bf16.mxu1 %v2372_v33 }
  0x72   : > { %2407 = vmatpush1.bf16.msra.mxu1 %v2374_v38 }
  0x73   : > { %2409 = vmatprep.subr.bf16.mxu1 %v2376_v39 }
  0x76   : > { %2367 = vmatpush1.bf16.xpose.msra.mxu0 %v2366_v26  ;;  %2411 = vmatpush1.bf16.msra.mxu1 %v2378_v44 }
  0x77   : > { %2369 = vmatprep.subr.bf16.mxu0 %v2368_v27  ;;  %2413 = vmatprep.subr.bf16.mxu1 %v2380_v45 }
  0x7a   : > { %2415 = vmatpush1.bf16.msra.mxu1 %v2382_v48 }
  0x7e   : > { %2371 = vmatpush1.bf16.xpose.msra.mxu0 %v2370_v32  ;;  %v725_v32 = vld [vmem:[#allocation5 + $0x118] sm:$0xff] }
  0x7f   : > { %2373 = vmatprep.subr.bf16.mxu0 %v2372_v33  ;;  %v722_v33 = vld [vmem:[#allocation5 + $0x100] sm:$0xff]  ;;  %v2416_v34 = vpack.c.bf16 %v725_v32, %v723_v31  ;;  %v749_v31 = vld [vmem:[#allocation5 + $0x1d8] sm:$0xff] }
  0x81   : > { %2417 = vmatprep.subr.bf16.mxu1 %v2416_v34 }
  0x86   : > { %2375 = vmatpush1.bf16.xpose.msra.mxu0 %v2374_v38  ;;  %v3204_v38 = vpack.c.bf16 %v724_v35, %v722_v33  ;;  %v748_v35 = vld [vmem:[#allocation5 + $0x1d0] sm:$0xff] }
  0x87   : > { %2377 = vmatprep.subr.bf16.mxu0 %v2376_v39  ;;  %v3206_v39 = vpack.c.bf16 %v729_v37, %v727_v36  ;;  %v751_v36 = vld [vmem:[#allocation5 + $0x1e8] sm:$0xff]  ;;  %v753_v37 = vld [vmem:[#allocation5 + $0x1f8] sm:$0xff] }
  0x8e   : > { %2379 = vmatpush1.bf16.xpose.msra.mxu0 %v2378_v44  ;;  %v3210_v44 = vpack.c.bf16 %v728_v41, %v726_v40  ;;  %v3242_v41 = vpack.c.bf16 %v753_v37, %v751_v36 }
  0x8f   : > { %2381 = vmatprep.subr.bf16.mxu0 %v2380_v45  ;;  %v3212_v45 = vpack.c.bf16 %v733_v43, %v731_v42  ;;  %v750_v42 = vld [vmem:[#allocation5 + $0x1e0] sm:$0xff]  ;;  %v752_v43 = vld [vmem:[#allocation5 + $0x1f0] sm:$0xff] }
  0x96   : > { %2383 = vmatpush1.bf16.xpose.msra.mxu0 %v2382_v48  ;;  %v735_v48 = vld [vmem:[#allocation5 + $0x168] sm:$0xff] }
  0x97   : > { %2449 = vmatprep.subr.bf16.mxu0 %v2416_v34  ;;  %v746_v34 = vld [vmem:[#allocation5 + $0x1c0] sm:$0xff] }
  0x98   : > { %v3240_v40 = vpack.c.bf16 %v748_v35, %v746_v34 }
  0x9d   : > { %436 = vmatmul.mubr.f32.vlgmr.msra.gmra.mrb[0].mxu0 %v3109_v49 }
  0x9e   : > { %440 = vmatprep.mubr.f32.mxu0 %v3112_v50  ;;  %2451 = vmatpush1.bf16.msra.mxu0 %v3204_v38 }
  0x9f   : > { %2453 = vmatprep.subr.bf16.mxu0 %v3206_v39 }
  0xa1   : > { %441 = vmatmul.mubr.f32.gmra.mrb[2].mxu0 %v3117_v51 }
  0xa2   : > { %445 = vmatprep.mubr.f32.mxu0 %v3120_v52  ;;  %2455 = vmatpush1.bf16.msra.mxu0 %v3210_v44 }
  0xa3   : > { %2457 = vmatprep.subr.bf16.mxu0 %v3212_v45 }
  0xa5   : > { %446 = vmatmul.mubr.f32.gmra.mrb[4].mxu0 %v3125_v53 }
  0xa6   : > { %450 = vmatprep.mubr.f32.mxu0 %v3128_v54 }
  0xa9   : > { %451 = vmatmul.mubr.f32.gmra.mrb[6].mxu0 %v3133_v55 }
  0xaa   : > { %455 = vmatprep.mubr.f32.mxu0 %v3136_v56 }
  0xad   : > { %456 = vmatmul.mubr.f32.gmra.mrb[8].mxu0 %v3141_v57 }
  0xae   : > { %460 = vmatprep.mubr.f32.mxu0 %v3144_v58 }
  0xb1   : > { %461 = vmatmul.mubr.f32.gmra.mrb[10].mxu0 %v3149_v59 }
  0xb2   : > { %465 = vmatprep.mubr.f32.mxu0 %v3152_v60 }
  0xb5   : > { %466 = vmatmul.mubr.f32.gmra.mrb[12].mxu0 %v3157_v61 }
  0xb6   : > { %470 = vmatprep.mubr.f32.mxu0 %v3160_v62 }
  0xb9   : > { %471 = vmatmul.mubr.f32.gmra.mrb[14].mxu0 %v3165_v63 }
  0xba   : > { %1007 = vmatprep.mubr.f32.mxu0 %v4107_v0 }
 0x170   : > { %v437_v6 = vpop.f32.mrb[0].mxu0 }
 0x171   : > { %v3180_v7 = vsub.f32 %v479_v5, %v437_v6  ;;  %v439_v8 = vpop.f32.mrb[1].mxu0  ;;  %v3218_v6 = vpack.c.bf16 %v737_v3, %v735_v48  ;;  %v4109_v3 = vmov 1.0  }
 0x172   : > { %v734_v8 = vld [vmem:[#allocation5 + $0x160] sm:$0xff] }
 0x173   : > { %488 = vmin.index.xlane.f32.xlu0 %v3180_v7 }
 0x174   : > { %v442_v9 = vpop.f32.mrb[2].mxu0 }
 0x175   : > { %v3183_v10 = vsub.f32 %v479_v5, %v442_v9  ;;  %v444_v11 = vpop.f32.mrb[3].mxu0  ;;  %v736_v9 = vld [vmem:[#allocation5 + $0x170] sm:$0xff] }
 0x176   : > { %v739_v11 = vld [vmem:[#allocation5 + $0x188] sm:$0xff] }
 0x177   : > { %490 = vmin.index.xlane.f32.xlu0 %v3183_v10 }
 0x178   : > { %v447_v12 = vpop.f32.mrb[4].mxu0 }
 0x179   : > { %v3186_v13 = vsub.f32 %v479_v5, %v447_v12  ;;  %v449_v14 = vpop.f32.mrb[5].mxu0  ;;  %v741_v12 = vld [vmem:[#allocation5 + $0x198] sm:$0xff] }
 0x17a   : > { %v3222_v14 = vpack.c.bf16 %v736_v9, %v734_v8 }
 0x17b   : > { %492 = vmin.index.xlane.f32.xlu1 %v3186_v13 }
 0x17c   : > { %v452_v15 = vpop.f32.mrb[6].mxu0 }
 0x17d   : > { %v3189_v16 = vsub.f32 %v479_v5, %v452_v15  ;;  %v454_v17 = vpop.f32.mrb[7].mxu0  ;;  %v3224_v15 = vpack.c.bf16 %v741_v12, %v739_v11 }
 0x17e   : > { %v738_v17 = vld [vmem:[#allocation5 + $0x180] sm:$0xff] }
 0x17f   : > { %494 = vmin.index.xlane.f32.xlu1 %v3189_v16 }
 0x180   : > { %v457_v18 = vpop.f32.mrb[8].mxu0 }
 0x181   : > { %v3192_v19 = vsub.f32 %v479_v5, %v457_v18  ;;  %v459_v21 = vpop.f32.mrb[9].mxu0  ;;  %v740_v18 = vld [vmem:[#allocation5 + $0x190] sm:$0xff] }
 0x182   : > { %v743_v21 = vld [vmem:[#allocation5 + $0x1a8] sm:$0xff] }
 0x183   : > { %4134 = vst [vmem:[#allocation15_spill] sm:$0xff] %v3192_v19  ;;  %496 = vmin.index.xlane.f32.xlu0 %v3192_v19  ;;  %v1163_v19 = vld [vmem:[#allocation5 + $0x2d8] sm:$0xff] }
 0x184   : > { %v462_v22 = vpop.f32.mrb[10].mxu0 }
 0x185   : > { %v3195_v23 = vsub.f32 %v479_v5, %v462_v22  ;;  %v464_v24 = vpop.f32.mrb[11].mxu0  ;;  %v745_v22 = vld [vmem:[#allocation5 + $0x1b8] sm:$0xff] }
 0x186   : > { %v3228_v24 = vpack.c.bf16 %v740_v18, %v738_v17 }
 0x187   : > { %4135 = vst [vmem:[#allocation16_spill] sm:$0xff] %v3195_v23  ;;  %498 = vmin.index.xlane.f32.xlu1 %v3195_v23  ;;  %v1159_v23 = vld [vmem:[#allocation5 + $0x2b8] sm:$0xff] }
 0x188   : > { %v467_v25 = vpop.f32.mrb[12].mxu0 }
 0x189   : > { %v3198_v26 = vsub.f32 %v479_v5, %v467_v25  ;;  %v469_v27 = vpop.f32.mrb[13].mxu0  ;;  %v3230_v25 = vpack.c.bf16 %v745_v22, %v743_v21 }
 0x18a   : > { %v742_v27 = vld [vmem:[#allocation5 + $0x1a0] sm:$0xff] }
 0x18b   : > { %4136 = vst [vmem:[#allocation17_spill] sm:$0xff] %v3198_v26  ;;  %500 = vmin.index.xlane.f32.xlu0 %v3198_v26  ;;  %v1149_v26 = vld [vmem:[#allocation5 + $0x268] sm:$0xff] }
 0x18c   : > { %v472_v28 = vpop.f32.mrb[14].mxu0 }
 0x18d   : > { %v3201_v29 = vsub.f32 %v479_v5, %v472_v28  ;;  %v474_v30 = vpop.f32.mrb[15].mxu0  ;;  %v3216_v5 = vpack.c.bf16 %v732_v47, %v730_v46  ;;  %v744_v28 = vld [vmem:[#allocation5 + $0x1b0] sm:$0xff]  ;;  %v3246_v46 = vpack.c.bf16 %v752_v43, %v750_v42  ;;  %v3250_v47 = vand.u32 127, %v297_v1 }
 0x18e   : > { %v747_v30 = vld [vmem:[#allocation5 + $0x1c8] sm:$0xff]  ;;  %v3234_v32 = vpack.c.bf16 %v744_v28, %v742_v27 }
 0x18f   : > { %4137 = vst [vmem:[#allocation18_spill] sm:$0xff] %v3201_v29  ;;  %502 = vmin.index.xlane.f32.xlu1 %v3201_v29  ;;  %2459 = vmatpush1.bf16.msra.mxu0 %v3216_v5  ;;  %v3236_v33 = vpack.c.bf16 %v749_v31, %v747_v30  ;;  %v1140_v29 = vld [vmem:[#allocation5 + $0x220] sm:$0xff] }
 0x190   : > { %2461 = vmatprep.subr.bf16.mxu0 %v3218_v6 }
 0x193   : > { %2463 = vmatpush1.bf16.msra.mxu0 %v3222_v14 }
 0x194   : > { %2465 = vmatprep.subr.bf16.mxu0 %v3224_v15 }
 0x197   : > { %2467 = vmatpush1.bf16.msra.mxu0 %v3228_v24 }
 0x198   : > { %2469 = vmatprep.subr.bf16.mxu0 %v3230_v25 }
 0x19b   : > { %2471 = vmatpush1.bf16.msra.mxu0 %v3234_v32 }
 0x19c   : > { %2473 = vmatprep.subr.bf16.mxu0 %v3236_v33 }
 0x19f   : > { %2475 = vmatpush1.bf16.msra.mxu0 %v3240_v40 }
 0x1a0   : > { %2477 = vmatprep.subr.bf16.mxu0 %v3242_v41 }
 0x1a3   : > { %2479 = vmatpush1.bf16.msra.mxu0 %v3246_v46 }
 0x200   : > { %v489_v48 = vpop.xlane.xlu0 %488 }
 0x201   : > { %vm520_vm0 = vcmp.eq.s32.totalorder %v3250_v47, %v489_v48 }
 0x202   : > { %2249 = vmatmul.mubr.msk.f32.vlgmr.msra.gmra.mrb[0].mxu1 %vm520_vm0, %v4109_v3  ;;  %v2241_v9 = vsel %vm520_vm0, 1.0, %v4107_v0 }
 0x203   : > { %678 = vmatprep.mubr.f32.mxu1 %v4107_v0  ;;  %2419 = vmatpush1.bf16.xpose.msra.mxu1 %v3204_v38 }
 0x204   : > { %v491_v8 = vpop.xlane.xlu0 %490  ;;  %2421 = vmatprep.subr.bf16.mxu1 %v3206_v39 }
 0x205   : > { %vm521_vm1 = vcmp.eq.s32.totalorder %v3250_v47, %v491_v8 }
 0x206   : > { %v2242_v1 = vsel %vm521_vm1, 1.0, %v4107_v0  ;;  %2250 = vmatmul.mubr.msk.f32.gmra.mrb[2].mxu1 %vm521_vm1, %v4109_v3 }
 0x207   : > { %v594_v11 = vadd.f32 %v2242_v1, %v2241_v9  ;;  %684 = vmatprep.mubr.f32.mxu1 %v4107_v0 }
 0x208   : > { %v493_v12 = vpop.xlane.xlu1 %492 }
 0x209   : > { %vm522_vm2 = vcmp.eq.s32.totalorder %v3250_v47, %v493_v12 }
 0x20a   : > { %v2243_v17 = vsel %vm522_vm2, 1.0, %v4107_v0  ;;  %2251 = vmatmul.mubr.msk.f32.gmra.mrb[4].mxu1 %vm522_vm2, %v4109_v3 }
 0x20b   : > { %v595_v38 = vadd.f32 %v2243_v17, %v594_v11  ;;  %690 = vmatprep.mubr.f32.mxu1 %v4107_v0  ;;  %2423 = vmatpush1.bf16.xpose.msra.mxu1 %v3210_v44 }
 0x20c   : > { %v495_v39 = vpop.xlane.xlu1 %494  ;;  %2425 = vmatprep.subr.bf16.mxu1 %v3212_v45 }
 0x20d   : > { %vm523_vm3 = vcmp.eq.s32.totalorder %v3250_v47, %v495_v39 }
 0x20e   : > { %v2244_v18 = vsel %vm523_vm3, 1.0, %v4107_v0  ;;  %2252 = vmatmul.mubr.msk.f32.gmra.mrb[6].mxu1 %vm523_vm3, %v4109_v3 }
 0x20f   : > { %v596_v21 = vadd.f32 %v2244_v18, %v595_v38  ;;  %696 = vmatprep.mubr.f32.mxu1 %v4107_v0 }
 0x210   : > { %v497_v22 = vpop.xlane.xlu0 %496 }
 0x211   : > { %vm524_vm4 = vcmp.eq.s32.totalorder %v3250_v47, %v497_v22 }
 0x212   : > { %v2245_v27 = vsel %vm524_vm4, 1.0, %v4107_v0  ;;  %2253 = vmatmul.mubr.msk.f32.gmra.mrb[8].mxu1 %vm524_vm4, %v4109_v3 }
 0x213   : > { %v597_v44 = vadd.f32 %v2245_v27, %v596_v21  ;;  %702 = vmatprep.mubr.f32.mxu1 %v4107_v0  ;;  %2427 = vmatpush1.bf16.xpose.msra.mxu1 %v3216_v5 }
 0x214   : > { %v499_v45 = vpop.xlane.xlu1 %498  ;;  %2429 = vmatprep.subr.bf16.mxu1 %v3218_v6 }
 0x215   : > { %vm525_vm5 = vcmp.eq.s32.totalorder %v3250_v47, %v499_v45 }
 0x216   : > { %v2246_v28 = vsel %vm525_vm5, 1.0, %v4107_v0  ;;  %2254 = vmatmul.mubr.msk.f32.gmra.mrb[10].mxu1 %vm525_vm5, %v4109_v3 }
 0x217   : > { %v598_v30 = vadd.f32 %v2246_v28, %v597_v44  ;;  %708 = vmatprep.mubr.f32.mxu1 %v4107_v0 }
 0x218   : > { %v501_v31 = vpop.xlane.xlu0 %500 }
 0x219   : > { %vm526_vm6 = vcmp.eq.s32.totalorder %v3250_v47, %v501_v31 }
 0x21a   : > { %v2247_v34 = vsel %vm526_vm6, 1.0, %v4107_v0  ;;  %2255 = vmatmul.mubr.msk.f32.gmra.mrb[12].mxu1 %vm526_vm6, %v4109_v3 }
 0x21b   : > { %v599_v5 = vadd.f32 %v2247_v34, %v598_v30  ;;  %714 = vmatprep.mubr.f32.mxu1 %v4107_v0  ;;  %2431 = vmatpush1.bf16.xpose.msra.mxu1 %v3222_v14 }
 0x21c   : > { %v503_v6 = vpop.xlane.xlu1 %502  ;;  %2433 = vmatprep.subr.bf16.mxu1 %v3224_v15 }
 0x21d   : > { %vm527_vm7 = vcmp.eq.s32.totalorder %v3250_v47, %v503_v6  ;;  %v877_v6 = vsub.s32 1, %v3171_v2 }
 0x21e   : > { %v2248_v35 = vsel %vm527_vm7, 1.0, %v4107_v0  ;;  %2256 = vmatmul.mubr.msk.f32.gmra.mrb[14].mxu1 %vm527_vm7, %v4109_v3  ;;  %v1143_v3 = vld [vmem:[#allocation5 + $0x238] sm:$0xff] }
 0x21f   : > { %v3291_v36 = vadd.f32 %v2248_v35, %v599_v5  ;;  %v878_v35 = vrot.slane %v3177_v4, %v877_v6 }
 0x223   : > { %2435 = vmatpush1.bf16.xpose.msra.mxu1 %v3228_v24 }
 0x224   : > { %2437 = vmatprep.subr.bf16.mxu1 %v3230_v25 }
 0x22b   : > { %2439 = vmatpush1.bf16.xpose.msra.mxu1 %v3234_v32 }
 0x22c   : > { %2441 = vmatprep.subr.bf16.mxu1 %v3236_v33 }
 0x233   : > { %2443 = vmatpush1.bf16.xpose.msra.mxu1 %v3240_v40 }
 0x234   : > { %2445 = vmatprep.subr.bf16.mxu1 %v3242_v41 }
 0x23b   : > { %2447 = vmatpush1.bf16.xpose.msra.mxu1 %v3246_v46 }
 0x2d5   : > { %v3300_v14 = vpop.f32.mrb[0].mxu1 }
 0x2d6   : > { %v3302_v15 = vpop.f32.mrb[1].mxu1  ;;  %v754_v24 = vsub.f32 %v3109_v49, %v3300_v14 }
 0x2d7   : > { %v755_v37 = vsub.f32 %v3105_v20, %v3302_v15 }
 0x2d9   : > { %v3308_v25 = vpop.f32.mrb[2].mxu1  ;;  %834 = vmatprep.mubr.f32.mxu1 %v755_v37 }
 0x2da   : > { %v3310_v32 = vpop.f32.mrb[3].mxu1  ;;  %835 = vmatmul.mubr.f32.vlgmr.msra.gmra.mrb[16].mxu1 %v754_v24  ;;  %v756_v40 = vsub.f32 %v3117_v51, %v3308_v25 }
 0x2db   : > { %v757_v33 = vsub.f32 %v3112_v50, %v3310_v32 }
 0x2dd   : > { %v3316_v41 = vpop.f32.mrb[4].mxu1  ;;  %839 = vmatprep.mubr.f32.mxu1 %v757_v33 }
 0x2de   : > { %v3318_v42 = vpop.f32.mrb[5].mxu1  ;;  %840 = vmatmul.mubr.f32.gmra.mrb[18].mxu1 %v756_v40  ;;  %v758_v46 = vsub.f32 %v3125_v53, %v3316_v41 }
 0x2df   : > { %v759_v43 = vsub.f32 %v3120_v52, %v3318_v42 }
 0x2e1   : > { %v3324_v48 = vpop.f32.mrb[6].mxu1  ;;  %844 = vmatprep.mubr.f32.mxu1 %v759_v43 }
 0x2e2   : > { %v3326_v8 = vpop.f32.mrb[7].mxu1  ;;  %845 = vmatmul.mubr.f32.gmra.mrb[20].mxu1 %v758_v46  ;;  %v760_v1 = vsub.f32 %v3133_v55, %v3324_v48 }
 0x2e3   : > { %v761_v9 = vsub.f32 %v3128_v54, %v3326_v8 }
 0x2e5   : > { %v3332_v11 = vpop.f32.mrb[8].mxu1  ;;  %849 = vmatprep.mubr.f32.mxu1 %v761_v9 }
 0x2e6   : > { %v3334_v12 = vpop.f32.mrb[9].mxu1  ;;  %850 = vmatmul.mubr.f32.gmra.mrb[22].mxu1 %v760_v1  ;;  %v762_v38 = vsub.f32 %v3141_v57, %v3332_v11 }
 0x2e7   : > { %v763_v17 = vsub.f32 %v3136_v56, %v3334_v12 }
 0x2e9   : > { %v3340_v39 = vpop.f32.mrb[10].mxu1  ;;  %854 = vmatprep.mubr.f32.mxu1 %v763_v17 }
 0x2ea   : > { %v3342_v18 = vpop.f32.mrb[11].mxu1  ;;  %855 = vmatmul.mubr.f32.gmra.mrb[24].mxu1 %v762_v38  ;;  %v764_v22 = vsub.f32 %v3149_v59, %v3340_v39 }
 0x2eb   : > { %v765_v21 = vsub.f32 %v3144_v58, %v3342_v18 }
 0x2ed   : > { %v3348_v27 = vpop.f32.mrb[12].mxu1  ;;  %859 = vmatprep.mubr.f32.mxu1 %v765_v21 }
 0x2ee   : > { %v3350_v44 = vpop.f32.mrb[13].mxu1  ;;  %860 = vmatmul.mubr.f32.gmra.mrb[26].mxu1 %v764_v22  ;;  %v766_v28 = vsub.f32 %v3157_v61, %v3348_v27 }
 0x2ef   : > { %v767_v45 = vsub.f32 %v3152_v60, %v3350_v44 }
 0x2f1   : > { %v3356_v30 = vpop.f32.mrb[14].mxu1  ;;  %864 = vmatprep.mubr.f32.mxu1 %v767_v45 }
 0x2f2   : > { %v3358_v31 = vpop.f32.mrb[15].mxu1  ;;  %865 = vmatmul.mubr.f32.gmra.mrb[28].mxu1 %v766_v28  ;;  %v768_v5 = vsub.f32 %v3165_v63, %v3356_v30 }
 0x2f3   : > { %v769_v34 = vsub.f32 %v3160_v62, %v3358_v31 }
 0x2f5   : > { %869 = vmatprep.mubr.f32.mxu1 %v769_v34 }
 0x2f6   : > { %870 = vmatmul.mubr.f32.gmra.mrb[30].mxu1 %v768_v5 }
 0x2f7   : > { %1421 = vmatprep.mubr.f32.mxu1 %v4107_v0  ;;  %v1138_v0 = vld [vmem:[#allocation5 + $0x210] sm:$0xff] }
 0x3ad   : > { %v836_v37 = vpop.f32.mrb[16].mxu1 }
 0x3ae   : > { %v3367_v24 = vsub.f32 %v878_v35, %v836_v37  ;;  %v838_v33 = vpop.f32.mrb[17].mxu1 }
 0x3b0   : > { %4138 = vst [vmem:[#allocation19_spill] sm:$0xff] %v3367_v24  ;;  %887 = vmin.index.xlane.f32.xlu0 %v3367_v24  ;;  %v1167_v24 = vld [vmem:[#allocation5 + $0x2f8] sm:$0xff] }
 0x3b1   : > { %v841_v40 = vpop.f32.mrb[18].mxu1 }
 0x3b2   : > { %v3370_v43 = vsub.f32 %v878_v35, %v841_v40  ;;  %v843_v46 = vpop.f32.mrb[19].mxu1 }
 0x3b4   : > { %4139 = vst [vmem:[#allocation20_spill] sm:$0xff] %v3370_v43  ;;  %889 = vmin.index.xlane.f32.xlu1 %v3370_v43  ;;  %v1165_v43 = vld [vmem:[#allocation5 + $0x2e8] sm:$0xff] }
 0x3b5   : > { %v846_v9 = vpop.f32.mrb[20].mxu1 }
 0x3b6   : > { %v3373_v1 = vsub.f32 %v878_v35, %v846_v9  ;;  %v848_v17 = vpop.f32.mrb[21].mxu1 }
 0x3b8   : > { %4140 = vst [vmem:[#allocation21_spill] sm:$0xff] %v3373_v1  ;;  %891 = vmin.index.xlane.f32.xlu0 %v3373_v1  ;;  %v1161_v1 = vld [vmem:[#allocation5 + $0x2c8] sm:$0xff] }
 0x3b9   : > { %v851_v38 = vpop.f32.mrb[22].mxu1 }
 0x3ba   : > { %v3376_v21 = vsub.f32 %v878_v35, %v851_v38  ;;  %v853_v22 = vpop.f32.mrb[23].mxu1 }
 0x3bb   : > { %v1137_v22 = vld [vmem:[#allocation5 + $0x208] sm:$0xff] }
 0x3bc   : > { %4141 = vst [vmem:[#allocation22_spill] sm:$0xff] %v3376_v21  ;;  %893 = vmin.index.xlane.f32.xlu1 %v3376_v21  ;;  %v1157_v21 = vld [vmem:[#allocation5 + $0x2a8] sm:$0xff] }
 0x3bd   : > { %v856_v45 = vpop.f32.mrb[24].mxu1 }
 0x3be   : > { %v3379_v28 = vsub.f32 %v878_v35, %v856_v45  ;;  %v858_v34 = vpop.f32.mrb[25].mxu1  ;;  %v1139_v45 = vld [vmem:[#allocation5 + $0x218] sm:$0xff] }
 0x3bf   : > { %v1136_v34 = vld [vmem:[#allocation5 + $0x200] sm:$0xff] }
 0x3c0   : > { %4142 = vst [vmem:[#allocation23_spill] sm:$0xff] %v3379_v28  ;;  %895 = vmin.index.xlane.f32.xlu0 %v3379_v28  ;;  %v1147_v28 = vld [vmem:[#allocation5 + $0x258] sm:$0xff] }
 0x3c1   : > { %v861_v5 = vpop.f32.mrb[26].mxu1 }
 0x3c2   : > { %v3382_v6 = vsub.f32 %v878_v35, %v861_v5  ;;  %v863_v37 = vpop.f32.mrb[27].mxu1  ;;  %v2480_v5 = vpack.c.bf16 %v1139_v45, %v1137_v22  ;;  %v1151_v22 = vld [vmem:[#allocation5 + $0x278] sm:$0xff]  ;;  %v1148_v45 = vld [vmem:[#allocation5 + $0x260] sm:$0xff] }
 0x3c3   : > { %v1141_v37 = vld [vmem:[#allocation5 + $0x228] sm:$0xff] }
 0x3c4   : > { %4143 = vst [vmem:[#allocation24_spill] sm:$0xff] %v3382_v6  ;;  %897 = vmin.index.xlane.f32.xlu1 %v3382_v6  ;;  %v2482_v6 = vpack.c.bf16 %v1138_v0, %v1136_v34  ;;  %2481 = vmatprep.subr.bf16.mxu0 %v2480_v5  ;;  %v1150_v34 = vld [vmem:[#allocation5 + $0x270] sm:$0xff] }
 0x3c5   : > { %v866_v33 = vpop.f32.mrb[28].mxu1  ;;  %2513 = vmatprep.subr.bf16.mxu1 %v2480_v5  ;;  %v1153_v5 = vld [vmem:[#allocation5 + $0x288] sm:$0xff] }
 0x3c6   : > { %v3385_v40 = vsub.f32 %v878_v35, %v866_v33  ;;  %v868_v46 = vpop.f32.mrb[29].mxu1  ;;  %v2484_v33 = vpack.c.bf16 %v1143_v3, %v1141_v37  ;;  %2515 = vmatpush1.bf16.msra.mxu1 %v2482_v6  ;;  %v3396_v3 = vpack.c.bf16 %v1151_v22, %v1149_v26  ;;  %v1155_v37 = vld [vmem:[#allocation5 + $0x298] sm:$0xff]  ;;  %v1158_v22 = vld [vmem:[#allocation5 + $0x2b0] sm:$0xff] }
 0x3c7   : > { %v1142_v46 = vld [vmem:[#allocation5 + $0x230] sm:$0xff] }
 0x3c8   : > { %4144 = vst [vmem:[#allocation25_spill] sm:$0xff] %v3385_v40  ;;  %899 = vmin.index.xlane.f32.xlu0 %v3385_v40  ;;  %v1145_v40 = vld [vmem:[#allocation5 + $0x248] sm:$0xff]  ;;  %2517 = vmatprep.subr.bf16.mxu1 %v2484_v33 }
 0x3c9   : > { %v871_v9 = vpop.f32.mrb[30].mxu1 }
 0x3ca   : > { %v3388_v17 = vsub.f32 %v878_v35, %v871_v9  ;;  %v873_v38 = vpop.f32.mrb[31].mxu1  ;;  %v2486_v35 = vpack.c.bf16 %v1142_v46, %v1140_v29  ;;  %v3391_v9 = vpack.c.bf16 %v1147_v28, %v1145_v40  ;;  %v3400_v29 = vpack.c.bf16 %v1150_v34, %v1148_v45  ;;  %v1152_v40 = vld [vmem:[#allocation5 + $0x280] sm:$0xff]  ;;  %v1154_v46 = vld [vmem:[#allocation5 + $0x290] sm:$0xff] }
 0x3cb   : > { %v1144_v38 = vld [vmem:[#allocation5 + $0x240] sm:$0xff]  ;;  %v3402_v28 = vpack.c.bf16 %v1155_v37, %v1153_v5  ;;  %v3406_v26 = vpack.c.bf16 %v1154_v46, %v1152_v40  ;;  %v3414_v34 = vpack.c.bf16 %v1163_v19, %v1161_v1  ;;  %v1162_v37 = vld [vmem:[#allocation5 + $0x2d0] sm:$0xff]  ;;  %v4146_v19 = vmov 1.0  }
 0x3cc   : > { %4145 = vst [vmem:[#allocation26_spill] sm:$0xff] %v3388_v17  ;;  %901 = vmin.index.xlane.f32.xlu1 %v3388_v17  ;;  %v1146_v17 = vld [vmem:[#allocation5 + $0x250] sm:$0xff]  ;;  %2519 = vmatpush1.bf16.msra.mxu1 %v2486_v35  ;;  %v1160_v5 = vld [vmem:[#allocation5 + $0x2c0] sm:$0xff]  ;;  %v4147_v1 = vmov 0.0  }
 0x3cd   : > { %2521 = vmatprep.subr.bf16.mxu1 %v3391_v9  ;;  %v3394_v0 = vpack.c.bf16 %v1146_v17, %v1144_v38  ;;  %v3408_v17 = vpack.c.bf16 %v1159_v23, %v1157_v21  ;;  %v1156_v38 = vld [vmem:[#allocation5 + $0x2a0] sm:$0xff]  ;;  %v3418_v23 = vpack.c.bf16 %v1162_v37, %v1160_v5  ;;  %v3420_v21 = vpack.c.bf16 %v1167_v24, %v1165_v43 }
 0x3ce   : > { %v3412_v45 = vpack.c.bf16 %v1158_v22, %v1156_v38 }
 0x3d0   : > { %2523 = vmatpush1.bf16.msra.mxu1 %v3394_v0 }
 0x3d1   : > { %2525 = vmatprep.subr.bf16.mxu1 %v3396_v3 }
 0x3d4   : > { %2527 = vmatpush1.bf16.msra.mxu1 %v3400_v29 }
 0x3d5   : > { %2529 = vmatprep.subr.bf16.mxu1 %v3402_v28 }
 0x3d8   : > { %2531 = vmatpush1.bf16.msra.mxu1 %v3406_v26 }
 0x3d9   : > { %2533 = vmatprep.subr.bf16.mxu1 %v3408_v17 }
 0x3dc   : > { %2535 = vmatpush1.bf16.msra.mxu1 %v3412_v45 }
 0x3dd   : > { %2537 = vmatprep.subr.bf16.mxu1 %v3414_v34 }
 0x3e0   : > { %2539 = vmatpush1.bf16.msra.mxu1 %v3418_v23 }
 0x3e1   : > { %2541 = vmatprep.subr.bf16.mxu1 %v3420_v21 }
 0x43d   : > { %v888_v40 = vpop.xlane.xlu0 %887 }
 0x43e   : > { %vm919_vm8 = vcmp.eq.s32.totalorder %v3250_v47, %v888_v40 }
 0x43f   : > { %2265 = vmatmul.mubr.msk.f32.vlgmr.msra.gmra.mrb[16].mxu0 %vm919_vm8, %v4146_v19  ;;  %v2257_v38 = vsel %vm919_vm8, 1.0, %v4147_v1 }
 0x440   : > { %1013 = vmatprep.mubr.f32.mxu0 %v4147_v1  ;;  %2483 = vmatpush1.bf16.xpose.msra.mxu0 %v2482_v6 }
 0x441   : > { %v890_v46 = vpop.xlane.xlu1 %889  ;;  %2485 = vmatprep.subr.bf16.mxu0 %v2484_v33 }
 0x442   : > { %vm920_vm9 = vcmp.eq.s32.totalorder %v3250_v47, %v890_v46 }
 0x443   : > { %v2258_v24 = vsel %vm920_vm9, 1.0, %v4147_v1  ;;  %2266 = vmatmul.mubr.msk.f32.gmra.mrb[18].mxu0 %vm920_vm9, %v4146_v19 }
 0x444   : > { %v1105_v43 = vadd.f32 %v2258_v24, %v2257_v38  ;;  %1019 = vmatprep.mubr.f32.mxu0 %v4147_v1 }
 0x445   : > { %v892_v22 = vpop.xlane.xlu0 %891 }
 0x446   : > { %vm921_vm10 = vcmp.eq.s32.totalorder %v3250_v47, %v892_v22 }
 0x447   : > { %v2259_v5 = vsel %vm921_vm10, 1.0, %v4147_v1  ;;  %2267 = vmatmul.mubr.msk.f32.gmra.mrb[20].mxu0 %vm921_vm10, %v4146_v19 }
 0x448   : > { %v1106_v6 = vadd.f32 %v2259_v5, %v1105_v43  ;;  %1025 = vmatprep.mubr.f32.mxu0 %v4147_v1  ;;  %2487 = vmatpush1.bf16.xpose.msra.mxu0 %v2486_v35  ;;  %v601_v43 = vrot.slane %v3291_v36, 4 }
 0x449   : > { %v894_v33 = vpop.xlane.xlu1 %893  ;;  %2489 = vmatprep.subr.bf16.mxu0 %v3391_v9 }
 0x44a   : > { %vm922_vm11 = vcmp.eq.s32.totalorder %v3250_v47, %v894_v33 }
 0x44b   : > { %v2260_v37 = vsel %vm922_vm11, 1.0, %v4147_v1  ;;  %2268 = vmatmul.mubr.msk.f32.gmra.mrb[22].mxu0 %vm922_vm11, %v4146_v19 }
 0x44c   : > { %v1107_v40 = vadd.f32 %v2260_v37, %v1106_v6  ;;  %1031 = vmatprep.mubr.f32.mxu0 %v4147_v1 }
 0x44d   : > { %v896_v46 = vpop.xlane.xlu0 %895 }
 0x44e   : > { %vm923_vm12 = vcmp.eq.s32.totalorder %v3250_v47, %v896_v46 }
 0x44f   : > { %v2261_v38 = vsel %vm923_vm12, 1.0, %v4147_v1  ;;  %2269 = vmatmul.mubr.msk.f32.gmra.mrb[24].mxu0 %vm923_vm12, %v4146_v19 }
 0x450   : > { %v1108_v35 = vadd.f32 %v2261_v38, %v1107_v40  ;;  %1037 = vmatprep.mubr.f32.mxu0 %v4147_v1  ;;  %2491 = vmatpush1.bf16.xpose.msra.mxu0 %v3394_v0  ;;  %v602_v0 = vadd.f32 %v601_v43, %v3291_v36 }
 0x451   : > { %v898_v9 = vpop.xlane.xlu1 %897  ;;  %2493 = vmatprep.subr.bf16.mxu0 %v3396_v3 }
 0x452   : > { %vm924_vm13 = vcmp.eq.s32.totalorder %v3250_v47, %v898_v9  ;;  %v603_v40 = vrot.slane %v602_v0, 2 }
 0x453   : > { %v2262_v24 = vsel %vm924_vm13, 1.0, %v4147_v1  ;;  %2270 = vmatmul.mubr.msk.f32.gmra.mrb[26].mxu0 %vm924_vm13, %v4146_v19 }
 0x454   : > { %v1109_v22 = vadd.f32 %v2262_v24, %v1108_v35  ;;  %1043 = vmatprep.mubr.f32.mxu0 %v4147_v1  ;;  %v604_v35 = vadd.f32 %v603_v40, %v602_v0 }
 0x455   : > { %v900_v5 = vpop.xlane.xlu0 %899 }
 0x456   : > { %vm925_vm14 = vcmp.eq.s32.totalorder %v3250_v47, %v900_v5 }
 0x457   : > { %v2263_v6 = vsel %vm925_vm14, 1.0, %v4147_v1  ;;  %2271 = vmatmul.mubr.msk.f32.gmra.mrb[28].mxu0 %vm925_vm14, %v4146_v19 }
 0x458   : > { %v1110_v3 = vadd.f32 %v2263_v6, %v1109_v22  ;;  %1049 = vmatprep.mubr.f32.mxu0 %v4147_v1  ;;  %2495 = vmatpush1.bf16.xpose.msra.mxu0 %v3400_v29  ;;  %v605_v29 = vrot.slane %v604_v35, 1  ;;  %v1164_v6 = vld [vmem:[#allocation5 + $0x2e0] sm:$0xff] }
 0x459   : > { %v902_v33 = vpop.xlane.xlu1 %901  ;;  %2497 = vmatprep.subr.bf16.mxu0 %v3402_v28 }
 0x45a   : > { %vm926_vm15 = vcmp.eq.s32.totalorder %v3250_v47, %v902_v33  ;;  %v606_v28 = vadd.f32 %v605_v29, %v604_v35 }
 0x45b   : > { %v2264_v37 = vsel %vm926_vm15, 1.0, %v4147_v1  ;;  %2272 = vmatmul.mubr.msk.f32.gmra.mrb[30].mxu0 %vm926_vm15, %v4146_v19 }
 0x45c   : > { %v1111_v46 = vadd.f32 %v2264_v37, %v1110_v3 }
 0x45e   : > { %v1112_v38 = vrot.slane %v1111_v46, 4 }
 0x460   : > { %v1113_v9 = vadd.f32 %v1112_v38, %v1111_v46  ;;  %2499 = vmatpush1.bf16.xpose.msra.mxu0 %v3406_v26  ;;  %v1166_v26 = vld [vmem:[#allocation5 + $0x2f0] sm:$0xff] }
 0x461   : > { %2501 = vmatprep.subr.bf16.mxu0 %v3408_v17  ;;  %v2510_v0 = vpack.c.bf16 %v1166_v26, %v1164_v6 }
 0x462   : > { %v1114_v36 = vrot.slane %v1113_v9, 2 }
 0x463   : > { %2543 = vmatpush1.bf16.msra.mxu1 %v2510_v0 }
 0x464   : > { %v1115_v24 = vadd.f32 %v1114_v36, %v1113_v9 }
 0x466   : > { %v1116_v43 = vrot.slane %v1115_v24, 1 }
 0x468   : > { %v1117_v22 = vadd.f32 %v1116_v43, %v1115_v24  ;;  %2503 = vmatpush1.bf16.xpose.msra.mxu0 %v3412_v45 }
 0x469   : > { %2505 = vmatprep.subr.bf16.mxu0 %v3414_v34 }
 0x46a   : > { %v3466_v5 = vadd.f32 %v1117_v22, %v606_v28 }
 0x470   : > { %2507 = vmatpush1.bf16.xpose.msra.mxu0 %v3418_v23 }
 0x471   : > { %2509 = vmatprep.subr.bf16.mxu0 %v3420_v21 }
 0x478   : > { %2511 = vmatpush1.bf16.xpose.msra.mxu0 %v2510_v0 }
 0x512   : > { %v1009_v17 = vpop.f32.mrb[16].mxu0 }
 0x513   : > { %v3471_v3 = vadd.f32 %v1009_v17, %v3300_v14  ;;  %v1011_v33 = vpop.f32.mrb[17].mxu0 }
 0x514   : > { %v3474_v45 = vadd.f32 %v1011_v33, %v3302_v15 }
 0x515   : > { %v1168_v23 = vsub.f32 %v3109_v49, %v3471_v3 }
 0x516   : > { %v1169_v34 = vsub.f32 %v3105_v20, %v3474_v45  ;;  %v1015_v37 = vpop.f32.mrb[18].mxu0 }
 0x517   : > { %v3481_v21 = vadd.f32 %v1015_v37, %v3308_v25  ;;  %v1017_v40 = vpop.f32.mrb[19].mxu0 }
 0x518   : > { %v3484_v46 = vadd.f32 %v1017_v40, %v3310_v32  ;;  %1248 = vmatprep.mubr.f32.mxu0 %v1169_v34 }
 0x519   : > { %1249 = vmatmul.mubr.f32.vlgmr.msra.gmra.mrb[32].mxu0 %v1168_v23  ;;  %v1170_v20 = vsub.f32 %v3117_v51, %v3481_v21 }
 0x51a   : > { %v1171_v14 = vsub.f32 %v3112_v50, %v3484_v46  ;;  %v1021_v15 = vpop.f32.mrb[20].mxu0 }
 0x51b   : > { %v3491_v38 = vadd.f32 %v1021_v15, %v3316_v41  ;;  %v1023_v49 = vpop.f32.mrb[21].mxu0 }
 0x51c   : > { %v3494_v25 = vadd.f32 %v1023_v49, %v3318_v42  ;;  %1253 = vmatprep.mubr.f32.mxu0 %v1171_v14 }
 0x51d   : > { %1254 = vmatmul.mubr.f32.gmra.mrb[34].mxu0 %v1170_v20  ;;  %v1172_v50 = vsub.f32 %v3125_v53, %v3491_v38 }
 0x51e   : > { %v1173_v32 = vsub.f32 %v3120_v52, %v3494_v25  ;;  %v1027_v35 = vpop.f32.mrb[22].mxu0 }
 0x51f   : > { %v3501_v9 = vadd.f32 %v1027_v35, %v3324_v48  ;;  %v1029_v51 = vpop.f32.mrb[23].mxu0 }
 0x520   : > { %v3504_v41 = vadd.f32 %v1029_v51, %v3326_v8  ;;  %1258 = vmatprep.mubr.f32.mxu0 %v1173_v32 }
 0x521   : > { %1259 = vmatmul.mubr.f32.gmra.mrb[36].mxu0 %v1172_v50  ;;  %v1174_v52 = vsub.f32 %v3133_v55, %v3501_v9 }
 0x522   : > { %v1175_v42 = vsub.f32 %v3128_v54, %v3504_v41  ;;  %v1033_v36 = vpop.f32.mrb[24].mxu0 }
 0x523   : > { %v3511_v29 = vadd.f32 %v1033_v36, %v3332_v11  ;;  %v1035_v53 = vpop.f32.mrb[25].mxu0 }
 0x524   : > { %v3514_v48 = vadd.f32 %v1035_v53, %v3334_v12  ;;  %1263 = vmatprep.mubr.f32.mxu0 %v1175_v42 }
 0x525   : > { %1264 = vmatmul.mubr.f32.gmra.mrb[38].mxu0 %v1174_v52  ;;  %v1176_v54 = vsub.f32 %v3141_v57, %v3511_v29 }
 0x526   : > { %v1177_v8 = vsub.f32 %v3136_v56, %v3514_v48  ;;  %v1039_v24 = vpop.f32.mrb[26].mxu0 }
 0x527   : > { %v3521_v43 = vadd.f32 %v1039_v24, %v3340_v39  ;;  %v1041_v55 = vpop.f32.mrb[27].mxu0  ;;  %v1551_v24 = vld [vmem:[#allocation5 + $0x308] sm:$0xff] }
 0x528   : > { %v3524_v11 = vadd.f32 %v1041_v55, %v3342_v18  ;;  %1268 = vmatprep.mubr.f32.mxu0 %v1177_v8  ;;  %v1550_v55 = vld [vmem:[#allocation5 + $0x300] sm:$0xff] }
 0x529   : > { %1269 = vmatmul.mubr.f32.gmra.mrb[40].mxu0 %v1176_v54  ;;  %v1178_v56 = vsub.f32 %v3149_v59, %v3521_v43  ;;  %v1553_v54 = vld [vmem:[#allocation5 + $0x318] sm:$0xff] }
 0x52a   : > { %v1179_v12 = vsub.f32 %v3144_v58, %v3524_v11  ;;  %v1045_v28 = vpop.f32.mrb[28].mxu0 }
 0x52b   : > { %v3531_v22 = vadd.f32 %v1045_v28, %v3348_v27  ;;  %v1047_v57 = vpop.f32.mrb[29].mxu0  ;;  %v1552_v28 = vld [vmem:[#allocation5 + $0x310] sm:$0xff] }
 0x52c   : > { %v3534_v39 = vadd.f32 %v1047_v57, %v3350_v44  ;;  %1273 = vmatprep.mubr.f32.mxu0 %v1179_v12  ;;  %v2544_v12 = vpack.c.bf16 %v1553_v54, %v1551_v24  ;;  %v1557_v57 = vld [vmem:[#allocation5 + $0x338] sm:$0xff] }
 0x52d   : > { %1274 = vmatmul.mubr.f32.gmra.mrb[42].mxu0 %v1178_v56  ;;  %v1180_v58 = vsub.f32 %v3157_v61, %v3531_v22  ;;  %v1555_v56 = vld [vmem:[#allocation5 + $0x328] sm:$0xff] }
 0x52e   : > { %v1181_v18 = vsub.f32 %v3152_v60, %v3534_v39  ;;  %v1051_v6 = vpop.f32.mrb[30].mxu0  ;;  %v1291_v60 = vsub.s32 2, %v3171_v2  ;;  %2545 = vmatprep.subr.bf16.mxu1 %v2544_v12  ;;  %2577 = vmatprep.subr.bf16.mxu0 %v2544_v12  ;;  %v1572_v12 = vld [vmem:[#allocation5 + $0x3b0] sm:$0xff] }
 0x52f   : > { %v3541_v26 = vadd.f32 %v1051_v6, %v3356_v30  ;;  %v1053_v59 = vpop.f32.mrb[31].mxu0  ;;  %v2548_v6 = vpack.c.bf16 %v1557_v57, %v1555_v56  ;;  %v1577_v56 = vld [vmem:[#allocation5 + $0x3d8] sm:$0xff] }
 0x530   : > { %v3544_v27 = vadd.f32 %v1053_v59, %v3358_v31  ;;  %1278 = vmatprep.mubr.f32.mxu0 %v1181_v18  ;;  %v1292_v61 = vrot.slane %v3177_v4, %v1291_v60  ;;  %v2546_v18 = vpack.c.bf16 %v1552_v28, %v1550_v55  ;;  %v1556_v59 = vld [vmem:[#allocation5 + $0x330] sm:$0xff]  ;;  %v1570_v55 = vld [vmem:[#allocation5 + $0x3a0] sm:$0xff]  ;;  %v1575_v28 = vld [vmem:[#allocation5 + $0x3c8] sm:$0xff] }
 0x531   : > { %1279 = vmatmul.mubr.f32.gmra.mrb[44].mxu0 %v1180_v58  ;;  %v1182_v0 = vsub.f32 %v3165_v63, %v3541_v26  ;;  %v1554_v58 = vld [vmem:[#allocation5 + $0x320] sm:$0xff]  ;;  %v3598_v57 = vpack.c.bf16 %v1572_v12, %v1570_v55 }
 0x532   : > { %v1183_v44 = vsub.f32 %v3160_v62, %v3544_v27  ;;  %2579 = vmatpush1.bf16.msra.mxu0 %v2546_v18  ;;  %v2550_v60 = vpack.c.bf16 %v1556_v59, %v1554_v58  ;;  %v3600_v58 = vpack.c.bf16 %v1577_v56, %v1575_v28  ;;  %v1574_v59 = vld [vmem:[#allocation5 + $0x3c0] sm:$0xff] }
 0x533   : > { %2581 = vmatprep.subr.bf16.mxu0 %v2548_v6 }
 0x534   : > { %1283 = vmatprep.mubr.f32.mxu0 %v1183_v44  ;;  %v1559_v44 = vld [vmem:[#allocation5 + $0x348] sm:$0xff] }
 0x535   : > { %1284 = vmatmul.mubr.f32.gmra.mrb[46].mxu0 %v1182_v0  ;;  %v1561_v0 = vld [vmem:[#allocation5 + $0x358] sm:$0xff] }
 0x536   : > { %1835 = vmatprep.mubr.f32.mxu0 %v4147_v1  ;;  %2583 = vmatpush1.bf16.msra.mxu0 %v2550_v60 }
 0x5ec   : > { %v1250_v30 = vpop.f32.mrb[32].mxu0 }
 0x5ed   : > { %v3553_v17 = vsub.f32 %v1292_v61, %v1250_v30  ;;  %v1252_v31 = vpop.f32.mrb[33].mxu0  ;;  %v1558_v30 = vld [vmem:[#allocation5 + $0x340] sm:$0xff] }
 0x5ee   : > { %v1560_v31 = vld [vmem:[#allocation5 + $0x350] sm:$0xff] }
 0x5ef   : > { %1301 = vmin.index.xlane.f32.xlu0 %v3553_v17 }
 0x5f0   : > { %v1255_v33 = vpop.f32.mrb[34].mxu0 }
 0x5f1   : > { %v3556_v34 = vsub.f32 %v1292_v61, %v1255_v33  ;;  %v1257_v62 = vpop.f32.mrb[35].mxu0  ;;  %v1563_v33 = vld [vmem:[#allocation5 + $0x368] sm:$0xff] }
 0x5f2   : > { %v1565_v62 = vld [vmem:[#allocation5 + $0x378] sm:$0xff] }
 0x5f3   : > { %1303 = vmin.index.xlane.f32.xlu1 %v3556_v34 }
 0x5f4   : > { %v1260_v63 = vpop.f32.mrb[36].mxu0 }
 0x5f5   : > { %v3559_v37 = vsub.f32 %v1292_v61, %v1260_v63  ;;  %v1262_v23 = vpop.f32.mrb[37].mxu0  ;;  %v3580_v63 = vpack.c.bf16 %v1560_v31, %v1558_v30  ;;  %v1581_v30 = vld [vmem:[#allocation5 + $0x3f8] sm:$0xff] }
 0x5f6   : > { %v3582_v23 = vpack.c.bf16 %v1565_v62, %v1563_v33 }
 0x5f7   : > { %1305 = vmin.index.xlane.f32.xlu0 %v3559_v37 }
 0x5f8   : > { %v1265_v40 = vpop.f32.mrb[38].mxu0 }
 0x5f9   : > { %v3562_v4 = vsub.f32 %v1292_v61, %v1265_v40  ;;  %v1267_v14 = vpop.f32.mrb[39].mxu0  ;;  %v1562_v40 = vld [vmem:[#allocation5 + $0x360] sm:$0xff] }
 0x5fa   : > { %v1564_v14 = vld [vmem:[#allocation5 + $0x370] sm:$0xff] }
 0x5fb   : > { %1307 = vmin.index.xlane.f32.xlu1 %v3562_v4 }
 0x5fc   : > { %v1270_v15 = vpop.f32.mrb[40].mxu0 }
 0x5fd   : > { %v3565_v20 = vsub.f32 %v1292_v61, %v1270_v15  ;;  %v1272_v49 = vpop.f32.mrb[41].mxu0  ;;  %v1567_v15 = vld [vmem:[#allocation5 + $0x388] sm:$0xff] }
 0x5fe   : > { %v1569_v49 = vld [vmem:[#allocation5 + $0x398] sm:$0xff] }
 0x5ff   : > { %1309 = vmin.index.xlane.f32.xlu0 %v3565_v20 }
 0x600   : > { %v1275_v32 = vpop.f32.mrb[42].mxu0 }
 0x601   : > { %v3568_v35 = vsub.f32 %v1292_v61, %v1275_v32  ;;  %v1277_v50 = vpop.f32.mrb[43].mxu0  ;;  %v3586_v32 = vpack.c.bf16 %v1564_v14, %v1562_v40 }
 0x602   : > { %v3588_v50 = vpack.c.bf16 %v1569_v49, %v1567_v15 }
 0x603   : > { %1311 = vmin.index.xlane.f32.xlu1 %v3568_v35 }
 0x604   : > { %v1280_v51 = vpop.f32.mrb[44].mxu0 }
 0x605   : > { %v3571_v42 = vsub.f32 %v1292_v61, %v1280_v51  ;;  %v1282_v36 = vpop.f32.mrb[45].mxu0  ;;  %v1566_v51 = vld [vmem:[#allocation5 + $0x380] sm:$0xff] }
 0x606   : > { %v1568_v36 = vld [vmem:[#allocation5 + $0x390] sm:$0xff] }
 0x607   : > { %1313 = vmin.index.xlane.f32.xlu0 %v3571_v42  ;;  %v3592_v24 = vpack.c.bf16 %v1568_v36, %v1566_v51 }
 0x608   : > { %v1285_v52 = vpop.f32.mrb[46].mxu0 }
 0x609   : > { %v3574_v53 = vsub.f32 %v1292_v61, %v1285_v52  ;;  %v1287_v8 = vpop.f32.mrb[47].mxu0  ;;  %v3577_v61 = vpack.c.bf16 %v1561_v0, %v1559_v44  ;;  %v1571_v52 = vld [vmem:[#allocation5 + $0x3a8] sm:$0xff]  ;;  %v1576_v44 = vld [vmem:[#allocation5 + $0x3d0] sm:$0xff] }
 0x60a   : > { %v1573_v8 = vld [vmem:[#allocation5 + $0x3b8] sm:$0xff]  ;;  %v1579_v0 = vld [vmem:[#allocation5 + $0x3e8] sm:$0xff]  ;;  %v3604_v31 = vpack.c.bf16 %v1576_v44, %v1574_v59 }
 0x60b   : > { %1315 = vmin.index.xlane.f32.xlu1 %v3574_v53  ;;  %2585 = vmatprep.subr.bf16.mxu0 %v3577_v61  ;;  %v3594_v54 = vpack.c.bf16 %v1573_v8, %v1571_v52  ;;  %v3606_v33 = vpack.c.bf16 %v1581_v30, %v1579_v0 }
 0x60c   : > { %2587 = vmatpush1.bf16.msra.mxu0 %v3580_v63 }
 0x60d   : > { %2589 = vmatprep.subr.bf16.mxu0 %v3582_v23 }
 0x610   : > { %2591 = vmatpush1.bf16.msra.mxu0 %v3586_v32 }
 0x611   : > { %2593 = vmatprep.subr.bf16.mxu0 %v3588_v50 }
 0x614   : > { %2595 = vmatpush1.bf16.msra.mxu0 %v3592_v24 }
 0x615   : > { %2597 = vmatprep.subr.bf16.mxu0 %v3594_v54 }
 0x618   : > { %2599 = vmatpush1.bf16.msra.mxu0 %v3598_v57 }
 0x619   : > { %2601 = vmatprep.subr.bf16.mxu0 %v3600_v58 }
 0x61c   : > { %2603 = vmatpush1.bf16.msra.mxu0 %v3604_v31 }
 0x61d   : > { %2605 = vmatprep.subr.bf16.mxu0 %v3606_v33 }
 0x67c   : > { %v1302_v62 = vpop.xlane.xlu0 %1301 }
 0x67d   : > { %vm1333_vm0 = vcmp.eq.s32.totalorder %v3250_v47, %v1302_v62 }
 0x67e   : > { %2281 = vmatmul.mubr.msk.f32.vlgmr.msra.gmra.mrb[32].mxu1 %vm1333_vm0, %v4146_v19  ;;  %v2273_v14 = vsel %vm1333_vm0, 1.0, %v4147_v1  ;;  %vm568_vm0 = vcmask 7168  }
 0x67f   : > { %1427 = vmatprep.mubr.f32.mxu1 %v4147_v1  ;;  %2547 = vmatpush1.bf16.xpose.msra.mxu1 %v2546_v18 }
 0x680   : > { %v1304_v40 = vpop.xlane.xlu1 %1303  ;;  %2549 = vmatprep.subr.bf16.mxu1 %v2548_v6 }
 0x681   : > { %vm1334_vm1 = vcmp.eq.s32.totalorder %v3250_v47, %v1304_v40 }
 0x682   : > { %v2274_v15 = vsel %vm1334_vm1, 1.0, %v4147_v1  ;;  %2282 = vmatmul.mubr.msk.f32.gmra.mrb[34].mxu1 %vm1334_vm1, %v4146_v19 }
 0x683   : > { %v1519_v49 = vadd.f32 %v2274_v15, %v2273_v14  ;;  %1433 = vmatprep.mubr.f32.mxu1 %v4147_v1 }
 0x684   : > { %v1306_v51 = vpop.xlane.xlu0 %1305 }
 0x685   : > { %vm1335_vm2 = vcmp.eq.s32.totalorder %v3250_v47, %v1306_v51  ;;  %v1580_v51 = vld [vmem:[#allocation5 + $0x3f0] sm:$0xff] }
 0x686   : > { %v2275_v36 = vsel %vm1335_vm2, 1.0, %v4147_v1  ;;  %2283 = vmatmul.mubr.msk.f32.gmra.mrb[36].mxu1 %vm1335_vm2, %v4146_v19 }
 0x687   : > { %v1520_v18 = vadd.f32 %v2275_v36, %v1519_v49  ;;  %1439 = vmatprep.mubr.f32.mxu1 %v4147_v1  ;;  %2551 = vmatpush1.bf16.xpose.msra.mxu1 %v2550_v60 }
 0x688   : > { %v1308_v6 = vpop.xlane.xlu1 %1307  ;;  %2553 = vmatprep.subr.bf16.mxu1 %v3577_v61 }
 0x689   : > { %vm1336_vm3 = vcmp.eq.s32.totalorder %v3250_v47, %v1308_v6  ;;  %v3667_v6 = vld [vmem:[%s3094_s7] sm:$0xff] }
 0x68a   : > { %v2276_v52 = vsel %vm1336_vm3, 1.0, %v4147_v1  ;;  %2284 = vmatmul.mubr.msk.f32.gmra.mrb[38].mxu1 %vm1336_vm3, %v4146_v19 }
 0x68b   : > { %v1521_v8 = vadd.f32 %v2276_v52, %v1520_v18  ;;  %1445 = vmatprep.mubr.f32.mxu1 %v4147_v1 }
 0x68c   : > { %v1310_v55 = vpop.xlane.xlu0 %1309 }
 0x68d   : > { %vm1337_vm4 = vcmp.eq.s32.totalorder %v3250_v47, %v1310_v55 }
 0x68e   : > { %v2277_v12 = vsel %vm1337_vm4, 1.0, %v4147_v1  ;;  %2285 = vmatmul.mubr.msk.f32.gmra.mrb[40].mxu1 %vm1337_vm4, %v4146_v19 }
 0x68f   : > { %v1522_v60 = vadd.f32 %v2277_v12, %v1521_v8  ;;  %1451 = vmatprep.mubr.f32.mxu1 %v4147_v1  ;;  %2555 = vmatpush1.bf16.xpose.msra.mxu1 %v3580_v63 }
 0x690   : > { %v1312_v61 = vpop.xlane.xlu1 %1311  ;;  %2557 = vmatprep.subr.bf16.mxu1 %v3582_v23 }
 0x691   : > { %vm1338_vm5 = vcmp.eq.s32.totalorder %v3250_v47, %v1312_v61  ;;  %v3683_v61 = vld [vmem:[%s3094_s7 + $0x10] sm:$0xff] }
 0x692   : > { %v2278_v28 = vsel %vm1338_vm5, 1.0, %v4147_v1  ;;  %2286 = vmatmul.mubr.msk.f32.gmra.mrb[42].mxu1 %vm1338_vm5, %v4146_v19 }
 0x693   : > { %v1523_v56 = vadd.f32 %v2278_v28, %v1522_v60  ;;  %1457 = vmatprep.mubr.f32.mxu1 %v4147_v1 }
 0x694   : > { %v1314_v59 = vpop.xlane.xlu0 %1313 }
 0x695   : > { %vm1339_vm6 = vcmp.eq.s32.totalorder %v3250_v47, %v1314_v59  ;;  %v3694_v59 = vld [vmem:[%s3094_s7 + $0x28] sm:$0xff] }
 0x696   : > { %v2279_v44 = vsel %vm1339_vm6, 1.0, %v4147_v1  ;;  %2287 = vmatmul.mubr.msk.f32.gmra.mrb[44].mxu1 %vm1339_vm6, %v4146_v19 }
 0x697   : > { %v1524_v63 = vadd.f32 %v2279_v44, %v1523_v56  ;;  %1463 = vmatprep.mubr.f32.mxu1 %v4147_v1  ;;  %2559 = vmatpush1.bf16.xpose.msra.mxu1 %v3586_v32 }
 0x698   : > { %v1316_v23 = vpop.xlane.xlu1 %1315  ;;  %2561 = vmatprep.subr.bf16.mxu1 %v3588_v50 }
 0x699   : > { %vm1340_vm7 = vcmp.eq.s32.totalorder %v3250_v47, %v1316_v23  ;;  %v3699_v23 = vld [vmem:[%s3094_s7 + $0x20] sm:$0xff] }
 0x69a   : > { %v2280_v0 = vsel %vm1340_vm7, 1.0, %v4147_v1  ;;  %2288 = vmatmul.mubr.msk.f32.gmra.mrb[46].mxu1 %vm1340_vm7, %v4146_v19 }
 0x69b   : > { %v1525_v30 = vadd.f32 %v2280_v0, %v1524_v63 }
 0x69d   : > { %v1526_v62 = vrot.slane %v1525_v30, 4 }
 0x69f   : > { %v1527_v40 = vadd.f32 %v1526_v62, %v1525_v30  ;;  %2563 = vmatpush1.bf16.xpose.msra.mxu1 %v3592_v24  ;;  %v1578_v24 = vld [vmem:[#allocation5 + $0x3e0] sm:$0xff]  ;;  %v3710_v62 = vld [vmem:[%s3094_s7 + $0x38] sm:$0xff] }
 0x6a0   : > { %2565 = vmatprep.subr.bf16.mxu1 %v3594_v54  ;;  %v2574_v54 = vpack.c.bf16 %v1580_v51, %v1578_v24  ;;  %v3726_v24 = vld [vmem:[%s3094_s7 + $0x48] sm:$0xff] }
 0x6a1   : > { %v1528_v14 = vrot.slane %v1527_v40, 2 }
 0x6a2   : > { %2607 = vmatpush1.bf16.msra.mxu0 %v2574_v54 }
 0x6a3   : > { %v1529_v15 = vadd.f32 %v1528_v14, %v1527_v40 }
 0x6a5   : > { %v1530_v49 = vrot.slane %v1529_v15, 1 }
 0x6a7   : > { %v1531_v32 = vadd.f32 %v1530_v49, %v1529_v15  ;;  %2567 = vmatpush1.bf16.xpose.msra.mxu1 %v3598_v57  ;;  %v3715_v15 = vld [vmem:[%s3094_s7 + $0x30] sm:$0xff] }
 0x6a8   : > { %2569 = vmatprep.subr.bf16.mxu1 %v3600_v58 }
 0x6a9   : > { %v3651_v50 = vadd.f32 %v1531_v32, %v3466_v5  ;;  %v3662_v5 = vld [vmem:[%s3094_s7 + $0x8] sm:$0xff] }
 0x6af   : > { %2571 = vmatpush1.bf16.xpose.msra.mxu1 %v3604_v31 }
 0x6b0   : > { %2573 = vmatprep.subr.bf16.mxu1 %v3606_v33 }
 0x6b7   : > { %2575 = vmatpush1.bf16.xpose.msra.mxu1 %v2574_v54 }
 0x751   : > { %v1423_v36 = vpop.f32.mrb[32].mxu1 }
 0x752   : > { %v3656_v18 = vadd.f32 %v1423_v36, %v3471_v3  ;;  %v1425_v57 = vpop.f32.mrb[33].mxu1  ;;  %v3731_v36 = vld [vmem:[%s3094_s7 + $0x40] sm:$0xff] }
 0x753   : > { %v3659_v58 = vadd.f32 %v1425_v57, %v3474_v45  ;;  %v3678_v45 = vld [vmem:[%s3094_s7 + $0x18] sm:$0xff] }
 0x754   : > { %v1582_v52 = vsub.f32 %v3667_v6, %v3656_v18 }
 0x755   : > { %v1583_v31 = vsub.f32 %v3662_v5, %v3659_v58  ;;  %v1429_v33 = vpop.f32.mrb[34].mxu1 }
 0x756   : > { %v3672_v3 = vadd.f32 %v1429_v33, %v3481_v21  ;;  %v1431_v8 = vpop.f32.mrb[35].mxu1  ;;  %v3742_v33 = vld [vmem:[%s3094_s7 + $0x58] sm:$0xff] }
 0x757   : > { %v3675_v55 = vadd.f32 %v1431_v8, %v3484_v46  ;;  %1662 = vmatprep.mubr.f32.mxu1 %v1583_v31 }
 0x758   : > { %1663 = vmatmul.mubr.f32.vlgmr.msra.gmra.mrb[48].mxu1 %v1582_v52  ;;  %v1584_v28 = vsub.f32 %v3683_v61, %v3672_v3 }
 0x759   : > { %v1585_v12 = vsub.f32 %v3678_v45, %v3675_v55  ;;  %v1435_v60 = vpop.f32.mrb[36].mxu1 }
 0x75a   : > { %v3688_v21 = vadd.f32 %v1435_v60, %v3491_v38  ;;  %v1437_v46 = vpop.f32.mrb[37].mxu1 }
 0x75b   : > { %v3691_v56 = vadd.f32 %v1437_v46, %v3494_v25  ;;  %1667 = vmatprep.mubr.f32.mxu1 %v1585_v12  ;;  %v3747_v12 = vld [vmem:[%s3094_s7 + $0x50] sm:$0xff]  ;;  %v3758_v46 = vld [vmem:[%s3094_s7 + $0x68] sm:$0xff] }
 0x75c   : > { %1668 = vmatmul.mubr.f32.gmra.mrb[50].mxu1 %v1584_v28  ;;  %v1586_v0 = vsub.f32 %v3699_v23, %v3688_v21 }
 0x75d   : > { %v1587_v44 = vsub.f32 %v3694_v59, %v3691_v56  ;;  %v1441_v63 = vpop.f32.mrb[38].mxu1 }
 0x75e   : > { %v3704_v38 = vadd.f32 %v1441_v63, %v3501_v9  ;;  %v1443_v25 = vpop.f32.mrb[39].mxu1 }
 0x75f   : > { %v3707_v30 = vadd.f32 %v1443_v25, %v3504_v41  ;;  %1672 = vmatprep.mubr.f32.mxu1 %v1587_v44 }
 0x760   : > { %1673 = vmatmul.mubr.f32.gmra.mrb[52].mxu1 %v1586_v0  ;;  %v1588_v49 = vsub.f32 %v3715_v15, %v3704_v38  ;;  %v3763_v0 = vld [vmem:[%s3094_s7 + $0x60] sm:$0xff] }
 0x761   : > { %v1589_v40 = vsub.f32 %v3710_v62, %v3707_v30  ;;  %v1447_v14 = vpop.f32.mrb[40].mxu1 }
 0x762   : > { %v3720_v9 = vadd.f32 %v1447_v14, %v3511_v29  ;;  %v1449_v41 = vpop.f32.mrb[41].mxu1  ;;  %v3774_v14 = vld [vmem:[%s3094_s7 + $0x78] sm:$0xff] }
 0x763   : > { %v3723_v32 = vadd.f32 %v1449_v41, %v3514_v48  ;;  %1677 = vmatprep.mubr.f32.mxu1 %v1589_v40  ;;  %v3779_v41 = vld [vmem:[%s3094_s7 + $0x70] sm:$0xff]  ;;  %s3950_s7 = scalar_lea.sflag [#allocation9], %s2034_s29 }
 0x764   : > { %1678 = vmatmul.mubr.f32.gmra.mrb[54].mxu1 %v1588_v49  ;;  %v1590_v57 = vsub.f32 %v3731_v36, %v3720_v9 }
 0x765   : > { %v1591_v51 = vsub.f32 %v3726_v24, %v3723_v32  ;;  %v1453_v54 = vpop.f32.mrb[42].mxu1 }
 0x766   : > { %v3736_v29 = vadd.f32 %v1453_v54, %v3521_v43  ;;  %v1455_v48 = vpop.f32.mrb[43].mxu1 }
 0x767   : > { %v3739_v31 = vadd.f32 %v1455_v48, %v3524_v11  ;;  %1682 = vmatprep.mubr.f32.mxu1 %v1591_v51 }
 0x768   : > { %1683 = vmatmul.mubr.f32.gmra.mrb[56].mxu1 %v1590_v57  ;;  %v1592_v60 = vsub.f32 %v3747_v12, %v3736_v29 }
 0x769   : > { %v1593_v52 = vsub.f32 %v3742_v33, %v3739_v31  ;;  %v1459_v8 = vpop.f32.mrb[44].mxu1 }
 0x76a   : > { %v3752_v43 = vadd.f32 %v1459_v8, %v3531_v22  ;;  %v1461_v11 = vpop.f32.mrb[45].mxu1 }
 0x76b   : > { %v3755_v28 = vadd.f32 %v1461_v11, %v3534_v39  ;;  %1687 = vmatprep.mubr.f32.mxu1 %v1593_v52 }
 0x76c   : > { %1688 = vmatmul.mubr.f32.gmra.mrb[58].mxu1 %v1592_v60  ;;  %v1594_v25 = vsub.f32 %v3763_v0, %v3752_v43 }
 0x76d   : > { %v1595_v44 = vsub.f32 %v3758_v46, %v3755_v28  ;;  %v1465_v63 = vpop.f32.mrb[46].mxu1 }
 0x76e   : > { %v3768_v22 = vadd.f32 %v1465_v63, %v3541_v26  ;;  %v1467_v40 = vpop.f32.mrb[47].mxu1  ;;  %v1705_v26 = vsub.s32 3, %v3171_v2 }
 0x76f   : > { %v3771_v39 = vadd.f32 %v1467_v40, %v3544_v27  ;;  %1692 = vmatprep.mubr.f32.mxu1 %v1595_v44  ;;  %v2707_v27 = vld [vmem:[%s4100_s2] sm:$0xf] }
 0x770   : > { %1693 = vmatmul.mubr.f32.gmra.mrb[60].mxu1 %v1594_v25  ;;  %v1596_v51 = vsub.f32 %v3779_v41, %v3768_v22  ;;  %v1706_v54 = vrot.slane %v2707_v27, %v1705_v26  ;;  %v299_v26 = vmul.f32 %v3667_v6, %v3667_v6  ;;  %v300_v27 = vmul.f32 %v3662_v5, %v3662_v5 }
 0x771   : > { %v1597_v49 = vsub.f32 %v3774_v14, %v3771_v39 }
 0x773   : > { %1697 = vmatprep.mubr.f32.mxu1 %v1597_v49 }
 0x774   : > { %1698 = vmatmul.mubr.f32.gmra.mrb[62].mxu1 %v1596_v51 }
 0x82b   : > { %v1664_v57 = vpop.f32.mrb[48].mxu1 }
 0x82c   : > { %v3787_v48 = vsub.f32 %v1706_v54, %v1664_v57  ;;  %v1666_v52 = vpop.f32.mrb[49].mxu1 }
 0x82e   : > { %1715 = vmin.index.xlane.f32.xlu0 %v3787_v48 }
 0x82f   : > { %v1669_v8 = vpop.f32.mrb[50].mxu1 }
 0x830   : > { %v3790_v60 = vsub.f32 %v1706_v54, %v1669_v8  ;;  %v1671_v11 = vpop.f32.mrb[51].mxu1 }
 0x831   : > { %v315_v11 = vadd.f32 %v300_v27, %v299_v26  ;;  %v303_v26 = vmul.f32 %v3699_v23, %v3699_v23  ;;  %v4148_v23 = vld [vmem:[#allocation19_spill] sm:$0xff] }
 0x832   : > { %1717 = vmin.index.xlane.f32.xlu1 %v3790_v60 }
 0x833   : > { %v1674_v44 = vpop.f32.mrb[52].mxu1 }
 0x834   : > { %v3793_v63 = vsub.f32 %v1706_v54, %v1674_v44  ;;  %v1676_v25 = vpop.f32.mrb[53].mxu1  ;;  %v302_v44 = vmul.f32 %v3678_v45, %v3678_v45 }
 0x836   : > { %1719 = vmin.index.xlane.f32.xlu0 %v3793_v63 }
 0x837   : > { %v1679_v40 = vpop.f32.mrb[54].mxu1 }
 0x838   : > { %v3796_v49 = vsub.f32 %v1706_v54, %v1679_v40  ;;  %v1681_v51 = vpop.f32.mrb[55].mxu1 }
 0x83a   : > { %504 = vmin.xlane.f32.xlu0 %v3180_v7  ;;  %1721 = vmin.index.xlane.f32.xlu1 %v3796_v49  ;;  %v301_v7 = vmul.f32 %v3683_v61, %v3683_v61  ;;  %v304_v61 = vmul.f32 %v3694_v59, %v3694_v59 }
 0x83b   : > { %v1684_v57 = vpop.f32.mrb[56].mxu1 }
 0x83c   : > { %v3804_v52 = vsub.f32 %v1706_v54, %v1684_v57  ;;  %v1686_v8 = vpop.f32.mrb[57].mxu1  ;;  %v318_v5 = vadd.f32 %v302_v44, %v301_v7  ;;  %v306_v7 = vmul.f32 %v3710_v62, %v3710_v62  ;;  %v4149_v44 = vld [vmem:[#allocation20_spill] sm:$0xff]  ;;  %v4153_v62 = vld [vmem:[#allocation22_spill] sm:$0xff] }
 0x83e   : > { %506 = vmin.xlane.f32.xlu1 %v3183_v10  ;;  %1723 = vmin.index.xlane.f32.xlu0 %v3804_v52 }
 0x83f   : > { %v1689_v25 = vpop.f32.mrb[58].mxu1 }
 0x840   : > { %v3812_v6 = vsub.f32 %v1706_v54, %v1689_v25  ;;  %v1691_v40 = vpop.f32.mrb[59].mxu1  ;;  %v321_v25 = vadd.f32 %v304_v61, %v303_v26  ;;  %v311_v26 = vmul.f32 %v3763_v0, %v3763_v0  ;;  %v312_v61 = vmul.f32 %v3758_v46, %v3758_v46 }
 0x841   : > { %v4150_v40 = vld [vmem:[#allocation15_spill] sm:$0xff]  ;;  %v314_v0 = vmul.f32 %v3774_v14, %v3774_v14 }
 0x842   : > { %1725 = vmin.index.xlane.f32.xlu1 %v3812_v6  ;;  %316 = vadd.xlane.f32.xlu0 %v315_v11  ;;  %v305_v11 = vmul.f32 %v3715_v15, %v3715_v15  ;;  %v4152_v15 = vld [vmem:[#allocation16_spill] sm:$0xff] }
 0x843   : > { %v1694_v51 = vpop.f32.mrb[60].mxu1 }
 0x844   : > { %v1713_v57 = vsub.f32 %v1706_v54, %v1694_v51  ;;  %v1696_v10 = vpop.f32.mrb[61].mxu1  ;;  %v324_v59 = vadd.f32 %v306_v7, %v305_v11  ;;  %v309_v51 = vmul.f32 %v3747_v12, %v3747_v12  ;;  %v333_v12 = vadd.f32 %v312_v61, %v311_v26 }
 0x845   : > { %v4154_v10 = vld [vmem:[#allocation17_spill] sm:$0xff] }
 0x846   : > { %319 = vadd.xlane.f32.xlu1 %v318_v5  ;;  %1727 = vmin.index.xlane.f32.xlu0 %v1713_v57  ;;  %v4151_v5 = vld [vmem:[#allocation21_spill] sm:$0xff] }
 0x847   : > { %v1699_v45 = vpop.f32.mrb[62].mxu1 }
 0x848   : > { %v1714_v27 = vsub.f32 %v1706_v54, %v1699_v45  ;;  %v1701_v8 = vpop.f32.mrb[63].mxu1  ;;  %v307_v54 = vmul.f32 %v3731_v36, %v3731_v36  ;;  %v310_v36 = vmul.f32 %v3742_v33, %v3742_v33  ;;  %v4155_v45 = vld [vmem:[#allocation23_spill] sm:$0xff]  ;;  %v4156_v33 = vld [vmem:[#allocation18_spill] sm:$0xff] }
 0x84a   : > { %1729 = vmin.index.xlane.f32.xlu1 %v1714_v27  ;;  %508 = vmin.xlane.f32.xlu0 %v3186_v13  ;;  %v308_v13 = vmul.f32 %v3726_v24, %v3726_v24  ;;  %v330_v24 = vadd.f32 %v310_v36, %v309_v51 }
 0x84e   : > { %322 = vadd.xlane.f32.xlu1 %v321_v25  ;;  %510 = vmin.xlane.f32.xlu0 %v3189_v16  ;;  %v327_v16 = vadd.f32 %v308_v13, %v307_v54 }
 0x852   : > { %903 = vmin.xlane.f32.xlu1 %v4148_v23  ;;  %905 = vmin.xlane.f32.xlu0 %v4149_v44 }
 0x856   : > { %325 = vadd.xlane.f32.xlu1 %v324_v59  ;;  %512 = vmin.xlane.f32.xlu0 %v4150_v40 }
 0x85a   : > { %907 = vmin.xlane.f32.xlu1 %v4151_v5  ;;  %328 = vadd.xlane.f32.xlu0 %v327_v16 }
 0x85e   : > { %514 = vmin.xlane.f32.xlu1 %v4152_v15  ;;  %909 = vmin.xlane.f32.xlu0 %v4153_v62 }
 0x862   : > { %1317 = vmin.xlane.f32.xlu1 %v3553_v17  ;;  %1319 = vmin.xlane.f32.xlu0 %v3556_v34  ;;  %v4157_v17 = vld [vmem:[#allocation24_spill] sm:$0xff]  ;;  %v313_v34 = vmul.f32 %v3779_v41, %v3779_v41 }
 0x864   : > { %v336_v46 = vadd.f32 %v314_v0, %v313_v34 }
 0x866   : > { %331 = vadd.xlane.f32.xlu1 %v330_v24  ;;  %516 = vmin.xlane.f32.xlu0 %v4154_v10 }
 0x86a   : > { %911 = vmin.xlane.f32.xlu1 %v4155_v45  ;;  %1321 = vmin.xlane.f32.xlu0 %v3559_v37  ;;  %v4158_v37 = vld [vmem:[#allocation25_spill] sm:$0xff] }
 0x86e   : > { %334 = vadd.xlane.f32.xlu1 %v333_v12  ;;  %518 = vmin.xlane.f32.xlu0 %v4156_v33 }
 0x872   : > { %913 = vmin.xlane.f32.xlu1 %v4157_v17  ;;  %1323 = vmin.xlane.f32.xlu0 %v3562_v4  ;;  %v4159_v4 = vld [vmem:[#allocation26_spill] sm:$0xff] }
 0x876   : > { %1731 = vmin.xlane.f32.xlu1 %v3787_v48  ;;  %1733 = vmin.xlane.f32.xlu0 %v3790_v60 }
 0x87a   : > { %337 = vadd.xlane.f32.xlu1 %v336_v46  ;;  %915 = vmin.xlane.f32.xlu0 %v4158_v37 }
 0x87e   : > { %1325 = vmin.xlane.f32.xlu1 %v3565_v20  ;;  %1735 = vmin.xlane.f32.xlu0 %v3793_v63 }
 0x882   : > { %917 = vmin.xlane.f32.xlu1 %v4159_v4  ;;  %1327 = vmin.xlane.f32.xlu0 %v3568_v35 }
 0x886   : > { %1737 = vmin.xlane.f32.xlu1 %v3796_v49  ;;  %1329 = vmin.xlane.f32.xlu0 %v3571_v42 }
 0x88a   : > { %1739 = vmin.xlane.f32.xlu1 %v3804_v52  ;;  %1331 = vmin.xlane.f32.xlu0 %v3574_v53 }
 0x88e   : > { %1741 = vmin.xlane.f32.xlu1 %v3812_v6  ;;  %1743 = vmin.xlane.f32.xlu0 %v1713_v57 }
 0x892   : > { %1745 = vmin.xlane.f32.xlu1 %v1714_v27 }
 0x8bb   : > { %v1716_v14 = vpop.xlane.xlu0 %1715 }
 0x8bc   : > { %vm1747_vm8 = vcmp.eq.s32.totalorder %v3250_v47, %v1716_v14 }
 0x8bd   : > { %2297 = vmatmul.mubr.msk.f32.vlgmr.msra.gmra.mrb[48].mxu0 %vm1747_vm8, %v4146_v19  ;;  %v2289_v35 = vsel %vm1747_vm8, 1.0, %v4147_v1 }
 0x8be   : > { %1841 = vmatprep.mubr.f32.mxu0 %v4147_v1 }
 0x8bf   : > { %v1718_v20 = vpop.xlane.xlu1 %1717 }
 0x8c0   : > { %vm1748_vm9 = vcmp.eq.s32.totalorder %v3250_v47, %v1718_v20 }
 0x8c1   : > { %v2290_v42 = vsel %vm1748_vm9, 1.0, %v4147_v1  ;;  %2298 = vmatmul.mubr.msk.f32.gmra.mrb[50].mxu0 %vm1748_vm9, %v4146_v19 }
 0x8c2   : > { %v1933_v53 = vadd.f32 %v2290_v42, %v2289_v35  ;;  %v2338_v41 = vpack.c.bf16 %v2290_v42, %v2289_v35  ;;  %1847 = vmatprep.mubr.f32.mxu0 %v4147_v1 }
 0x8c3   : > { %v1720_v48 = vpop.xlane.xlu0 %1719 }
 0x8c4   : > { %2339 = vst [vmem:[%s3876_s6] sm:$0xff] %v2338_v41   ;;  %vm1749_vm10 = vcmp.eq.s32.totalorder %v3250_v47, %v1720_v48 }
 0x8c5   : > { %v2291_v60 = vsel %vm1749_vm10, 1.0, %v4147_v1  ;;  %2299 = vmatmul.mubr.msk.f32.gmra.mrb[52].mxu0 %vm1749_vm10, %v4146_v19 }
 0x8c6   : > { %v1934_v63 = vadd.f32 %v2291_v60, %v1933_v53  ;;  %1853 = vmatprep.mubr.f32.mxu0 %v4147_v1 }
 0x8c7   : > { %v505_v49 = vpop.xlane.xlu0 %504  ;;  %v1722_v52 = vpop.xlane.xlu1 %1721 }
 0x8c8   : > { %vm1750_vm11 = vcmp.eq.s32.totalorder %v3250_v47, %v1722_v52  ;;  %v544_v48 = vmul.f32 2.0, %v505_v49 }
 0x8c9   : > { %v2292_v6 = vsel %vm1750_vm11, 1.0, %v4147_v1  ;;  %2300 = vmatmul.mubr.msk.f32.gmra.mrb[54].mxu0 %vm1750_vm11, %v4146_v19 }
 0x8ca   : > { %v1935_v57 = vadd.f32 %v2292_v6, %v1934_v63  ;;  %v2341_v27 = vpack.c.bf16 %v2292_v6, %v2291_v60  ;;  %1859 = vmatprep.mubr.f32.mxu0 %v4147_v1 }
 0x8cb   : > { %v507_v8 = vpop.xlane.xlu1 %506  ;;  %v1724_v25 = vpop.xlane.xlu0 %1723 }
 0x8cc   : > { %2349 = vst [vmem:[%s3876_s6 + $0x8] sm:$0xff] %v2341_v27   ;;  %vm1751_vm12 = vcmp.eq.s32.totalorder %v3250_v47, %v1724_v25  ;;  %v545_v52 = vmul.f32 2.0, %v507_v8 }
 0x8cd   : > { %v2293_v11 = vsel %vm1751_vm12, 1.0, %v4147_v1  ;;  %2301 = vmatmul.mubr.msk.f32.gmra.mrb[56].mxu0 %vm1751_vm12, %v4146_v19 }
 0x8ce   : > { %v1936_v7 = vadd.f32 %v2293_v11, %v1935_v57  ;;  %1865 = vmatprep.mubr.f32.mxu0 %v4147_v1 }
 0x8cf   : > { %v1726_v23 = vpop.xlane.xlu1 %1725  ;;  %v317_v44 = vpop.xlane.xlu0 %316 }
 0x8d0   : > { %vm1752_vm13 = vcmp.eq.s32.totalorder %v3250_v47, %v1726_v23  ;;  %v552_v6 = vadd.f32 %v544_v48, %v317_v44 }
 0x8d1   : > { %v2294_v59 = vsel %vm1752_vm13, 1.0, %v4147_v1  ;;  %2302 = vmatmul.mubr.msk.f32.gmra.mrb[58].mxu0 %vm1752_vm13, %v4146_v19 }
 0x8d2   : > { %v1937_v54 = vadd.f32 %v2294_v59, %v1936_v7  ;;  %v2344_v13 = vpack.c.bf16 %v2294_v59, %v2293_v11  ;;  %1871 = vmatprep.mubr.f32.mxu0 %v4147_v1 }
 0x8d3   : > { %v320_v40 = vpop.xlane.xlu1 %319  ;;  %v1728_v16 = vpop.xlane.xlu0 %1727 }
 0x8d4   : > { %2350 = vst [vmem:[%s3876_s6 + $0x10] sm:$0xff] %v2344_v13   ;;  %vm1753_vm14 = vcmp.eq.s32.totalorder %v3250_v47, %v1728_v16  ;;  %v553_v27 = vadd.f32 %v545_v52, %v320_v40  ;;  %v560_v13 = vmax.f32 %v552_v6, 0.0 }
 0x8d5   : > { %v2295_v5 = vsel %vm1753_vm14, 1.0, %v4147_v1  ;;  %2303 = vmatmul.mubr.msk.f32.gmra.mrb[60].mxu0 %vm1753_vm14, %v4146_v19 }
 0x8d6   : > { %v1938_v15 = vadd.f32 %v2295_v5, %v1937_v54  ;;  %1877 = vmatprep.mubr.f32.mxu0 %v4147_v1  ;;  %v561_v16 = vmax.f32 %v553_v27, 0.0 }
 0x8d7   : > { %v1730_v62 = vpop.xlane.xlu1 %1729  ;;  %v509_v51 = vpop.xlane.xlu0 %508 }
 0x8d8   : > { %vm1754_vm15 = vcmp.eq.s32.totalorder %v3250_v47, %v1730_v62  ;;  %v546_v57 = vmul.f32 2.0, %v509_v51 }
 0x8d9   : > { %v2296_v36 = vsel %vm1754_vm15, 1.0, %v4147_v1  ;;  %2304 = vmatmul.mubr.msk.f32.gmra.mrb[62].mxu0 %vm1754_vm15, %v4146_v19 }
 0x8da   : > { %v1939_v24 = vadd.f32 %v2296_v36, %v1938_v15  ;;  %v2347_v10 = vpack.c.bf16 %v2296_v36, %v2295_v5 }
 0x8db   : > { %v323_v26 = vpop.xlane.xlu1 %322  ;;  %v511_v61 = vpop.xlane.xlu0 %510 }
 0x8dc   : > { %v1940_v45 = vrot.slane %v1939_v24, 4  ;;  %2351 = vst [vmem:[%s3876_s6 + $0x18] sm:$0xff] %v2347_v10   ;;  %v554_v25 = vadd.f32 %v546_v57, %v323_v26  ;;  %v547_v59 = vmul.f32 2.0, %v511_v61  ;;  %v570_v10 = vsel %vm568_vm0, %v561_v16, 0.0 }
 0x8de   : > { %v1941_v12 = vadd.f32 %v1940_v45, %v1939_v24  ;;  %v562_v62 = vmax.f32 %v554_v25, 0.0 }
 0x8df   : > { %v904_v33 = vpop.xlane.xlu1 %903  ;;  %v906_v17 = vpop.xlane.xlu0 %905 }
 0x8e0   : > { %v1942_v34 = vrot.slane %v1941_v12, 2  ;;  %v1056_v11 = vmul.f32 2.0, %v904_v33  ;;  %v1057_v54 = vmul.f32 2.0, %v906_v17 }
 0x8e2   : > { %v1943_v0 = vadd.f32 %v1942_v34, %v1941_v12  ;;  %v1064_v36 = vadd.f32 %v1056_v11, %v560_v13  ;;  %v1065_v8 = vadd.f32 %v1057_v54, %v561_v16  ;;  %v569_v12 = vsel %vm568_vm0, %v560_v13, 0.0 }
 0x8e3   : > { %v326_v46 = vpop.xlane.xlu1 %325  ;;  %v513_v37 = vpop.xlane.xlu0 %512 }
 0x8e4   : > { %v1944_v4 = vrot.slane %v1943_v0, 1  ;;  %v555_v5 = vadd.f32 %v547_v59, %v326_v46  ;;  %v548_v15 = vmul.f32 2.0, %v513_v37  ;;  %v1072_v33 = vmax.f32 %v1064_v36, 0.0 }
 0x8e5   : > { %v572_v46 = vsel %vm568_vm0, %v562_v62, 0.0  ;;  %v1073_v37 = vmax.f32 %v1065_v8, 0.0 }
 0x8e6   : > { %v1945_v14 = vadd.f32 %v1944_v4, %v1943_v0  ;;  %v563_v26 = vmax.f32 %v555_v5, 0.0  ;;  %v1080_v57 = vsel %vm568_vm0, %v1072_v33, 0.0 }
 0x8e7   : > { %v908_v20 = vpop.xlane.xlu1 %907  ;;  %v329_v35 = vpop.xlane.xlu0 %328  ;;  %v1081_v59 = vsel %vm568_vm0, %v1073_v37, 0.0 }
 0x8e8   : > { %v3906_v1 = vadd.f32 %v1945_v14, %v3651_v50  ;;  %v1058_v50 = vmul.f32 2.0, %v908_v20  ;;  %v556_v44 = vadd.f32 %v548_v15, %v329_v35  ;;  %v571_v20 = vadd.f32 %v570_v10, %v569_v12 }
 0x8e9   : > { %v574_v48 = vsel %vm568_vm0, %v563_v26, 0.0 }
 0x8ea   : > { %v1066_v40 = vadd.f32 %v1058_v50, %v562_v62  ;;  %v564_v4 = vmax.f32 %v556_v44, 0.0 }
 0x8eb   : > { %v515_v19 = vpop.xlane.xlu1 %514  ;;  %v910_v42 = vpop.xlane.xlu0 %909 }
 0x8ec   : > { %v549_v51 = vmul.f32 2.0, %v515_v19  ;;  %v1059_v17 = vmul.f32 2.0, %v910_v42  ;;  %v1074_v35 = vmax.f32 %v1066_v40, 0.0  ;;  %v576_v54 = vsel %vm568_vm0, %v564_v4, 0.0 }
 0x8ee   : > { %v1067_v27 = vadd.f32 %v1059_v17, %v563_v26 }
 0x8ef   : > { %v1318_v53 = vpop.xlane.xlu1 %1317  ;;  %v1320_v41 = vpop.xlane.xlu0 %1319 }
 0x8f0   : > { %v1470_v19 = vmul.f32 2.0, %v1318_v53  ;;  %v1471_v52 = vmul.f32 2.0, %v1320_v41  ;;  %v1083_v53 = vsel %vm568_vm0, %v1074_v35, 0.0  ;;  %v1075_v8 = vmax.f32 %v1067_v27, 0.0 }
 0x8f2   : > { %v1478_v5 = vadd.f32 %v1470_v19, %v1072_v33  ;;  %v1479_v15 = vadd.f32 %v1471_v52, %v1073_v37 }
 0x8f3   : > { %v332_v60 = vpop.xlane.xlu1 %331  ;;  %v517_v63 = vpop.xlane.xlu0 %516 }
 0x8f4   : > { %v557_v45 = vadd.f32 %v549_v51, %v332_v60  ;;  %v550_v61 = vmul.f32 2.0, %v517_v63  ;;  %v573_v63 = vadd.f32 %v572_v46, %v571_v20  ;;  %v1486_v17 = vmax.f32 %v1478_v5, 0.0 }
 0x8f6   : > { %v565_v6 = vmax.f32 %v557_v45, 0.0  ;;  %v575_v16 = vadd.f32 %v574_v48, %v573_v63 }
 0x8f7   : > { %v912_v7 = vpop.xlane.xlu1 %911  ;;  %v1322_v23 = vpop.xlane.xlu0 %1321 }
 0x8f8   : > { %v1060_v60 = vmul.f32 2.0, %v912_v7  ;;  %v1472_v42 = vmul.f32 2.0, %v1322_v23  ;;  %v578_v7 = vsel %vm568_vm0, %v565_v6, 0.0  ;;  %v577_v23 = vadd.f32 %v576_v54, %v575_v16 }
 0x8fa   : > { %v1068_v62 = vadd.f32 %v1060_v60, %v564_v4  ;;  %v1480_v44 = vadd.f32 %v1472_v42, %v1074_v35  ;;  %v579_v33 = vadd.f32 %v578_v7, %v577_v23 }
 0x8fb   : > { %v335_v49 = vpop.xlane.xlu1 %334  ;;  %v519_v24 = vpop.xlane.xlu0 %518 }
 0x8fc   : > { %v558_v14 = vadd.f32 %v550_v61, %v335_v49  ;;  %v551_v36 = vmul.f32 2.0, %v519_v24  ;;  %v1082_v49 = vadd.f32 %v1081_v59, %v1080_v57  ;;  %v1076_v46 = vmax.f32 %v1068_v62, 0.0 }
 0x8fd   : > { %v1085_v24 = vsel %vm568_vm0, %v1075_v8, 0.0  ;;  %v1488_v52 = vmax.f32 %v1480_v44, 0.0  ;;  %v1494_v57 = vsel %vm568_vm0, %v1486_v17, 0.0 }
 0x8fe   : > { %v566_v13 = vmax.f32 %v558_v14, 0.0  ;;  %v1084_v12 = vadd.f32 %v1083_v53, %v1082_v49 }
 0x8ff   : > { %v914_v34 = vpop.xlane.xlu1 %913  ;;  %v1324_v0 = vpop.xlane.xlu0 %1323 }
 0x900   : > { %v1061_v50 = vmul.f32 2.0, %v914_v34  ;;  %v1473_v41 = vmul.f32 2.0, %v1324_v0  ;;  %v580_v10 = vsel %vm568_vm0, %v566_v13, 0.0  ;;  %v1487_v0 = vmax.f32 %v1479_v15, 0.0 }
 0x901   : > { %v581_v48 = vadd.f32 %v580_v10, %v579_v33  ;;  %v1497_v15 = vsel %vm568_vm0, %v1488_v52, 0.0 }
 0x902   : > { %v1069_v26 = vadd.f32 %v1061_v50, %v565_v6  ;;  %v1481_v34 = vadd.f32 %v1473_v41, %v1075_v8  ;;  %v1495_v54 = vsel %vm568_vm0, %v1487_v0, 0.0 }
 0x903   : > { %v1732_v25 = vpop.xlane.xlu1 %1731  ;;  %v1734_v11 = vpop.xlane.xlu0 %1733  ;;  %v1496_v49 = vadd.f32 %v1495_v54, %v1494_v57 }
 0x904   : > { %v1884_v14 = vmul.f32 2.0, %v1732_v25  ;;  %v1885_v20 = vmul.f32 2.0, %v1734_v11  ;;  %v1077_v60 = vmax.f32 %v1069_v26, 0.0  ;;  %v1489_v27 = vmax.f32 %v1481_v34, 0.0 }
 0x905   : > { %v1086_v11 = vadd.f32 %v1085_v24, %v1084_v12 }
 0x906   : > { %v1892_v16 = vadd.f32 %v1884_v14, %v1486_v17  ;;  %v1893_v53 = vadd.f32 %v1885_v20, %v1487_v0  ;;  %v1089_v7 = vsel %vm568_vm0, %v1077_v60, 0.0  ;;  %v1499_v8 = vsel %vm568_vm0, %v1489_v27, 0.0 }
 0x907   : > { %v338_v51 = vpop.xlane.xlu1 %337  ;;  %v916_v40 = vpop.xlane.xlu0 %915 }
 0x908   : > { %v559_v45 = vadd.f32 %v551_v36, %v338_v51  ;;  %v1062_v61 = vmul.f32 2.0, %v916_v40  ;;  %v1901_v12 = vmax.f32 %v1893_v53, 0.0 }
 0x90a   : > { %v567_v37 = vmax.f32 %v559_v45, 0.0  ;;  %v1070_v4 = vadd.f32 %v1062_v61, %v566_v13  ;;  %v1087_v13 = vsel %vm568_vm0, %v1076_v46, 0.0  ;;  %v1498_v45 = vadd.f32 %v1497_v15, %v1496_v49 }
 0x90b   : > { %v1326_v35 = vpop.xlane.xlu1 %1325  ;;  %v1736_v19 = vpop.xlane.xlu0 %1735  ;;  %v1088_v23 = vadd.f32 %v1087_v13, %v1086_v11  ;;  %v1900_v61 = vmax.f32 %v1892_v16, 0.0 }
 0x90c   : > { %v1474_v6 = vmul.f32 2.0, %v1326_v35  ;;  %v582_v63 = vsel %vm568_vm0, %v567_v37, 0.0  ;;  %v1886_v42 = vmul.f32 2.0, %v1736_v19  ;;  %v1078_v50 = vmax.f32 %v1070_v4, 0.0 }
 0x90d   : > { %v583_v59 = vadd.f32 %v582_v63, %v581_v48  ;;  %v1090_v34 = vadd.f32 %v1089_v7, %v1088_v23  ;;  %v1500_v14 = vadd.f32 %v1499_v8, %v1498_v45 }
 0x90e   : > { %v1482_v25 = vadd.f32 %v1474_v6, %v1076_v46  ;;  %v1894_v44 = vadd.f32 %v1886_v42, %v1488_v52  ;;  %v1091_v26 = vsel %vm568_vm0, %v1078_v50, 0.0  ;;  %v1909_v6 = vsel %vm568_vm0, %v1901_v12, 0.0 }
 0x90f   : > { %v918_v5 = vpop.xlane.xlu1 %917  ;;  %584 = vadd.xlane.f32.xlu0 %v583_v59  ;;  %v1328_v41 = vpop.xlane.xlu0 %1327  ;;  %v1092_v35 = vadd.f32 %v1091_v26, %v1090_v34 }
 0x910   : > { %v1063_v62 = vmul.f32 2.0, %v918_v5  ;;  %v1475_v36 = vmul.f32 2.0, %v1328_v41  ;;  %v1490_v51 = vmax.f32 %v1482_v25, 0.0  ;;  %v1902_v20 = vmax.f32 %v1894_v44, 0.0 }
 0x912   : > { %v1071_v40 = vadd.f32 %v1063_v62, %v567_v37  ;;  %v1483_v10 = vadd.f32 %v1475_v36, %v1077_v60  ;;  %v1501_v19 = vsel %vm568_vm0, %v1490_v51, 0.0  ;;  %v1908_v60 = vsel %vm568_vm0, %v1900_v61, 0.0 }
 0x913   : > { %v1738_v17 = vpop.xlane.xlu1 %1737  ;;  %v1330_v33 = vpop.xlane.xlu0 %1329  ;;  %v1502_v16 = vadd.f32 %v1501_v19, %v1500_v14  ;;  %v1910_v41 = vadd.f32 %v1909_v6, %v1908_v60 }
 0x914   : > { %v1079_v0 = vmax.f32 %v1071_v40, 0.0  ;;  %v1491_v46 = vmax.f32 %v1483_v10, 0.0  ;;  %v1887_v4 = vmul.f32 2.0, %v1738_v17  ;;  %v1476_v24 = vmul.f32 2.0, %v1330_v33 }
 0x916   : > { %v1895_v48 = vadd.f32 %v1887_v4, %v1489_v27  ;;  %v1484_v37 = vadd.f32 %v1476_v24, %v1078_v50  ;;  %v1093_v52 = vsel %vm568_vm0, %v1079_v0, 0.0  ;;  %v1503_v63 = vsel %vm568_vm0, %v1491_v46, 0.0 }
 0x917   : > { %v1740_v57 = vpop.xlane.xlu1 %1739  ;;  %v1332_v42 = vpop.xlane.xlu0 %1331  ;;  %v1094_v59 = vadd.f32 %v1093_v52, %v1092_v35  ;;  %v1911_v27 = vsel %vm568_vm0, %v1902_v20, 0.0  ;;  %v1504_v36 = vadd.f32 %v1503_v63, %v1502_v16 }
 0x918   : > { %v1903_v54 = vmax.f32 %v1895_v48, 0.0  ;;  %v1492_v13 = vmax.f32 %v1484_v37, 0.0  ;;  %v1888_v25 = vmul.f32 2.0, %v1740_v57  ;;  %v1477_v11 = vmul.f32 2.0, %v1332_v42 }
 0x919   : > { %1095 = vadd.xlane.f32.xlu1 %v1094_v59  ;;  %v1912_v40 = vadd.f32 %v1911_v27, %v1910_v41 }
 0x91a   : > { %v1896_v50 = vadd.f32 %v1888_v25, %v1490_v51  ;;  %v1485_v53 = vadd.f32 %v1477_v11, %v1079_v0  ;;  %v1505_v5 = vsel %vm568_vm0, %v1492_v13, 0.0  ;;  %v1913_v15 = vsel %vm568_vm0, %v1903_v54, 0.0 }
 0x91b   : > { %v1742_v7 = vpop.xlane.xlu1 %1741  ;;  %v1744_v62 = vpop.xlane.xlu0 %1743  ;;  %v1506_v10 = vadd.f32 %v1505_v5, %v1504_v36  ;;  %v1914_v12 = vadd.f32 %v1913_v15, %v1912_v40 }
 0x91c   : > { %v1904_v49 = vmax.f32 %v1896_v50, 0.0  ;;  %v1493_v23 = vmax.f32 %v1485_v53, 0.0  ;;  %v1889_v8 = vmul.f32 2.0, %v1742_v7  ;;  %v1890_v44 = vmul.f32 2.0, %v1744_v62 }
 0x91e   : > { %v1915_v26 = vsel %vm568_vm0, %v1904_v49, 0.0  ;;  %v1897_v45 = vadd.f32 %v1889_v8, %v1491_v46  ;;  %v1898_v61 = vadd.f32 %v1890_v44, %v1492_v13  ;;  %v1507_v51 = vsel %vm568_vm0, %v1493_v23, 0.0 }
 0x91f   : > { %v1746_v17 = vpop.xlane.xlu1 %1745  ;;  %v1508_v33 = vadd.f32 %v1507_v51, %v1506_v10  ;;  %v1916_v24 = vadd.f32 %v1915_v26, %v1914_v12 }
 0x920   : > { %v1905_v34 = vmax.f32 %v1897_v45, 0.0  ;;  %v1906_v0 = vmax.f32 %v1898_v61, 0.0  ;;  %v1891_v4 = vmul.f32 2.0, %v1746_v17 }
 0x921   : > { %1509 = vadd.xlane.f32.xlu0 %v1508_v33 }
 0x922   : > { %v1917_v14 = vsel %vm568_vm0, %v1905_v34, 0.0  ;;  %v1899_v20 = vadd.f32 %v1891_v4, %v1493_v23  ;;  %v1919_v19 = vsel %vm568_vm0, %v1906_v0, 0.0 }
 0x923   : > { %v1918_v35 = vadd.f32 %v1917_v14, %v1916_v24 }
 0x924   : > { %v1907_v46 = vmax.f32 %v1899_v20, 0.0 }
 0x925   : > { %v1920_v48 = vadd.f32 %v1919_v19, %v1918_v35 }
 0x926   : > { %v1921_v37 = vsel %vm568_vm0, %v1907_v46, 0.0 }
 0x927   : > { %v1922_v52 = vadd.f32 %v1921_v37, %v1920_v48 }
 0x929   : > { %1923 = vadd.xlane.f32.xlu1 %v1922_v52 }
 0x92a   : > { %2779 = shalt.err (!%p2776_p7)
}
 0x92b   : > { %s2780_s15 = scalar_lea.hbm %s3948_s28, 512  ;;  %s2784_s11 = scalar_lea.hbm %s4102_s4, 1024 }
 0x92c   : > { %p2781_p9 = scmp.ne.s32.totalorder %s3948_s28, %s2780_s15  ;;  %p2785_p5 = scmp.lt.u32.totalorder %s3948_s28, %s4102_s4 }
 0x92d   : > { %p2786_p11 = scmp.lt.u32.totalorder %s2784_s11, %s2780_s15  ;;  %p2788_p4 = scmp.lt.u32.totalorder %s2780_s15, %s3948_s28 }
 0x92e   : > { %p2782_p1 = pnand %p2781_p9, %p3037_p12 }
 0x92f   : > { %p2787_p2 = por %p2786_p11, %p2785_p5 }
 0x930   : > { %p2783_p0 = pneg %p2782_p1 }
 0x931   : > { %p2789_p6 = por %p2788_p4, %p2787_p2 }
 0x933   : > { %p2790_p8 = pnand %p2789_p6, %p2783_p0 }
 0x935   : > { %2793 = shalt.err (!%p2790_p8)
}
 0x936   : > { %s2905_s24 = smov 64   ;;  %s2906_s26 = smov 4  }
 0x937   : > { %2623 = dma.vmem_to_hbm [thread:$0]  (%p3037_p12), %s3941_s27, 512, %s3948_s28, %s3950_s7, %s2905_s24, %s2905_s24, %s2906_s26  }
 0x938   : > { %s3978_s16 = scalar_lea.vmem [#allocation7], %s2236_s13  ;;  %s2335_s13 = sshll.u32 %s2962_s22, 11 }
 0x939   : > { %s2054_s27 = sshll.u32 %s3978_s16, 4  ;;  %s4012_s15 = scalar_lea.hbm %s4101_s3, %s2335_s13  ;;  %s4014_s27 = int_to_ptr.vmem [resolvable:$true] %s2054_s27 }
 0x93a   : > { %s2030_s6 = scalar_lea.sflag [#allocation4], %s3088_s8  ;;  %s2794_s29 = scalar_lea.vmem %s4014_s27, 2048 }
 0x93b   : > { %p2795_p10 = scmp.ne.s32.totalorder %s4014_s27, %s2794_s29  ;;  %s2907_s11 = smov [#allocation7]  }
 0x93c   : > { %s2798_s12 = sshll.u32 %s2907_s11, 4  ;;  %s2799_s12 = int_to_ptr.vmem [resolvable:$false] %s2798_s12 }
 0x93d   : > { %p2796_p13 = pnand %p2795_p10, %p3037_p12  ;;  %s2800_s14 = scalar_lea.vmem %s2799_s12, 4096 }
 0x93e   : > { %p2801_p7 = scmp.lt.s32.totalorder %s4014_s27, %s2799_s12  ;;  %p2802_p9 = scmp.lt.s32.totalorder %s2800_s14, %s2794_s29 }
 0x93f   : > { %p2797_p3 = pneg %p2796_p13 }
 0x940   : > { %p2803_p1 = por %p2802_p9, %p2801_p7 }
 0x942   : > { %p2804_p0 = pnand %p2803_p1, %p2797_p3 }
 0x990   : > { %v1837_v60 = vpop.f32.mrb[48].mxu0 }
 0x991   : > { %v1947_v6 = vadd.f32 %v1837_v60, %v3656_v18  ;;  %v1839_v63 = vpop.f32.mrb[49].mxu0 }
 0x992   : > { %v1948_v57 = vadd.f32 %v1839_v63, %v3659_v58 }
 0x993   : > { %1963 = vst [vmem:[%s3978_s16] sm:$0xff] %v1947_v6 }
 0x994   : > { %1964 = vst [vmem:[%s3978_s16 + $0x8] sm:$0xff] %v1948_v57  ;;  %v1843_v42 = vpop.f32.mrb[50].mxu0 }
 0x995   : > { %v1949_v59 = vadd.f32 %v1843_v42, %v3672_v3  ;;  %v1845_v54 = vpop.f32.mrb[51].mxu0 }
 0x996   : > { %v1950_v18 = vadd.f32 %v1845_v54, %v3675_v55 }
 0x997   : > { %1965 = vst [vmem:[%s3978_s16 + $0x10] sm:$0xff] %v1949_v59 }
 0x998   : > { %1966 = vst [vmem:[%s3978_s16 + $0x18] sm:$0xff] %v1950_v18  ;;  %v1849_v58 = vpop.f32.mrb[52].mxu0 }
 0x999   : > { %v1951_v13 = vadd.f32 %v1849_v58, %v3688_v21  ;;  %v1851_v25 = vpop.f32.mrb[53].mxu0 }
 0x99a   : > { %v1952_v11 = vadd.f32 %v1851_v25, %v3691_v56 }
 0x99b   : > { %1967 = vst [vmem:[%s3978_s16 + $0x20] sm:$0xff] %v1951_v13 }
 0x99c   : > { %1968 = vst [vmem:[%s3978_s16 + $0x28] sm:$0xff] %v1952_v11  ;;  %v1855_v16 = vpop.f32.mrb[54].mxu0  ;;  %v585_v27 = vpop.xlane.xlu0 %584 }
 0x99d   : > { %v1953_v3 = vadd.f32 %v1855_v16, %v3704_v38  ;;  %v586_v50 = vrot.slane %v585_v27, 4  ;;  %v1857_v53 = vpop.f32.mrb[55].mxu0 }
 0x99e   : > { %v1954_v55 = vadd.f32 %v1857_v53, %v3707_v30 }
 0x99f   : > { %1969 = vst [vmem:[%s3978_s16 + $0x30] sm:$0xff] %v1953_v3  ;;  %v587_v5 = vadd.f32 %v586_v50, %v585_v27 }
 0x9a0   : > { %1970 = vst [vmem:[%s3978_s16 + $0x38] sm:$0xff] %v1954_v55  ;;  %v1861_v21 = vpop.f32.mrb[56].mxu0 }
 0x9a1   : > { %v588_v41 = vrot.slane %v587_v5, 2  ;;  %v1955_v56 = vadd.f32 %v1861_v21, %v3720_v9  ;;  %v1863_v15 = vpop.f32.mrb[57].mxu0 }
 0x9a2   : > { %v1956_v7 = vadd.f32 %v1863_v15, %v3723_v32 }
 0x9a3   : > { %1971 = vst [vmem:[%s3978_s16 + $0x40] sm:$0xff] %v1955_v56  ;;  %v589_v62 = vadd.f32 %v588_v41, %v587_v5 }
 0x9a4   : > { %1972 = vst [vmem:[%s3978_s16 + $0x48] sm:$0xff] %v1956_v7  ;;  %v1867_v38 = vpop.f32.mrb[58].mxu0 }
 0x9a5   : > { %v1957_v36 = vadd.f32 %v1867_v38, %v3736_v29  ;;  %v1869_v30 = vpop.f32.mrb[59].mxu0  ;;  %v590_v49 = vrot.slane %v589_v62, 1 }
 0x9a6   : > { %v1958_v23 = vadd.f32 %v1869_v30, %v3739_v31  ;;  %v1096_v8 = vpop.xlane.xlu1 %1095 }
 0x9a7   : > { %1973 = vst [vmem:[%s3978_s16 + $0x50] sm:$0xff] %v1957_v36  ;;  %v1097_v9 = vrot.slane %v1096_v8, 4  ;;  %v591_v44 = vadd.f32 %v590_v49, %v589_v62 }
 0x9a8   : > { %1974 = vst [vmem:[%s3978_s16 + $0x58] sm:$0xff] %v1958_v23  ;;  %v1873_v32 = vpop.f32.mrb[60].mxu0 }
 0x9a9   : > { %v1098_v40 = vadd.f32 %v1097_v9, %v1096_v8  ;;  %v1959_v10 = vadd.f32 %v1873_v32, %v3752_v43  ;;  %2608 = vpush %v591_v44  ;;  %v1875_v26 = vpop.f32.mrb[61].mxu0 }
 0x9aa   : > { %v1960_v29 = vadd.f32 %v1875_v26, %v3755_v28 }
 0x9ab   : > { %v1099_v45 = vrot.slane %v1098_v40, 2  ;;  %1975 = vst [vmem:[%s3978_s16 + $0x60] sm:$0xff] %v1959_v10 }
 0x9ac   : > { %1976 = vst [vmem:[%s3978_s16 + $0x68] sm:$0xff] %v1960_v29  ;;  %v1879_v31 = vpop.f32.mrb[62].mxu0 }
 0x9ad   : > { %v1961_v61 = vadd.f32 %v1879_v31, %v3768_v22  ;;  %v1881_v51 = vpop.f32.mrb[63].mxu0  ;;  %v1100_v12 = vadd.f32 %v1099_v45, %v1098_v40 }
 0x9ae   : > { %v1962_v43 = vadd.f32 %v1881_v51, %v3771_v39  ;;  %v1510_v28 = vpop.xlane.xlu0 %1509 }
 0x9af   : > { %1977 = vst [vmem:[%s3978_s16 + $0x70] sm:$0xff] %v1961_v61  ;;  %v1511_v17 = vrot.slane %v1510_v28, 4  ;;  %v1101_v33 = vrot.slane %v1100_v12, 1 }
 0x9b0   : > { %1978 = vst [vmem:[%s3978_s16 + $0x78] sm:$0xff] %v1962_v43 }
 0x9b1   : > { %v1512_v22 = vadd.f32 %v1511_v17, %v1510_v28  ;;  %v1102_v34 = vadd.f32 %v1101_v33, %v1100_v12 }
 0x9b2   : > { %2807 = shalt.err (!%p2804_p0)
}
 0x9b3   : > { %s2808_s24 = scalar_lea.hbm %s4012_s15, 2048  ;;  %s2812_s13 = scalar_lea.hbm %s4101_s3, 4096 }
 0x9b4   : > { %p2809_p5 = scmp.ne.s32.totalorder %s4012_s15, %s2808_s24  ;;  %p2813_p4 = scmp.lt.u32.totalorder %s4012_s15, %s4101_s3 }
 0x9b5   : > { %p2814_p6 = scmp.lt.u32.totalorder %s2812_s13, %s2808_s24  ;;  %p2816_p10 = scmp.lt.u32.totalorder %s2808_s24, %s4012_s15 }
 0x9b6   : > { %p2810_p11 = pnand %p2809_p5, %p3037_p12 }
 0x9b7   : > { %p2815_p8 = por %p2814_p6, %p2813_p4 }
 0x9b8   : > { %p2811_p2 = pneg %p2810_p11 }
 0x9b9   : > { %p2817_p13 = por %p2816_p10, %p2815_p8 }
 0x9bb   : > { %p2818_p3 = pnand %p2817_p13, %p2811_p2 }
 0x9bd   : > { %2821 = shalt.err (!%p2818_p3)
}
 0x9be   : > { %s2908_s29 = smov 256   ;;  %s2909_s11 = smov 16   ;;  %v1513_v39 = vrot.slane %v1512_v22, 2  ;;  %2610 = vpush %v1102_v34  ;;  %v1924_v4 = vpop.xlane.xlu1 %1923  ;;  %vm2023_vm1 = vcmp.eq.s32.totalorder %v3171_v2, 1  ;;  %vm2024_vm2 = vcmp.eq.s32.totalorder %v3250_v47, 0  ;;  %vm2021_vm3 = vcmp.eq.s32.totalorder %v3171_v2, 0 }
 0x9bf   : > { %2622 = dma.vmem_to_hbm [thread:$0]  (%p3037_p12), %s4014_s27, 2048, %s4012_s15, %s2030_s6, %s2908_s29, %s2908_s29, %s2909_s11   ;;  %v1925_v24 = vrot.slane %v1924_v4, 4  ;;  %vm2025_vm4 = vmand %vm2023_vm1, %vm2024_vm2  ;;  %v2022_v52 = vsel %vm2021_vm3, %v3906_v1, 0.0 }
 0x9c0   : > { %v1514_v0 = vadd.f32 %v1513_v39, %v1512_v22  ;;  %s2240_s24 = sshll.u32 %s3088_s8, 3  ;;  %s2321_s26 = sshll.u32 %s2962_s22, 7 }
 0x9c1   : > { %v1926_v20 = vadd.f32 %v1925_v24, %v1924_v4  ;;  %s276_s13 = scalar_lea.vmem [#allocation10], %s2240_s24  ;;  %s4052_s11 = scalar_lea.hbm %s4103_s5, %s2321_s26 }
 0x9c2   : > { %v1515_v14 = vrot.slane %v1514_v0, 1  ;;  %s2086_s28 = sshll.u32 %s276_s13, 4  ;;  %s4054_s28 = int_to_ptr.vmem [resolvable:$true] %s2086_s28 }
 0x9c3   : > { %v1927_v46 = vrot.slane %v1926_v20, 2  ;;  %s2822_s22 = scalar_lea.vmem %s4054_s28, 128 }
 0x9c4   : > { %v1516_v35 = vadd.f32 %v1515_v14, %v1514_v0  ;;  %p2823_p7 = scmp.ne.s32.totalorder %s4054_s28, %s2822_s22 }
 0x9c5   : > { %v1928_v19 = vadd.f32 %v1927_v46, %v1926_v20 }
 0x9c6   : > { %2612 = vpush %v1516_v35  ;;  %p2824_p9 = pnand %p2823_p7, %p3037_p12 }
 0x9c7   : > { %v1929_v48 = vrot.slane %v1928_v19, 1 }
 0x9c8   : > { %p2825_p1 = pneg %p2824_p9 }
 0x9c9   : > { %v1930_v37 = vadd.f32 %v1929_v48, %v1928_v19 }
 0x9cb   : > { %2614 = vpush %v1930_v37 }
 0x9da   : > { %s2609_s12 = spop %2608 }
 0x9ef   : > { %s2611_s14 = spop %2610 }
 0x9f0   : > { %s1104_s15 = sadd.f32 %s2611_s14, %s2609_s12  ;;  %s2910_s12 = smov [#allocation10]  }
 0x9f1   : > { %s2826_s14 = sshll.u32 %s2910_s12, 4  ;;  %s2827_s14 = int_to_ptr.vmem [resolvable:$false] %s2826_s14 }
 0x9f2   : > { %s2828_s24 = scalar_lea.vmem %s2827_s14, 256  ;;  %p2829_p0 = scmp.lt.s32.totalorder %s4054_s28, %s2827_s14 }
 0x9f3   : > { %p2830_p5 = scmp.lt.s32.totalorder %s2828_s24, %s2822_s22 }
 0x9f5   : > { %p2831_p11 = por %p2830_p5, %p2829_p0 }
 0x9f7   : > { %s2613_s27 = spop %2612  ;;  %p2832_p2 = pnand %p2831_p11, %p2825_p1 }
 0x9f8   : > { %s1518_s6 = sadd.f32 %s2613_s27, %s1104_s15 }
 0x9fc   : > { %s2615_s16 = spop %2614 }
 0x9fd   : > { %s1932_s17 = sadd.f32 %s2615_s16, %s1518_s6 }
 0x9ff   : > { %v2026_v60 = vstv %s1932_s17 }
 0xa00   : > { %v2027_v47 = vsel %vm2025_vm4, %v2026_v60, %v2022_v52 }
 0xa01   : > { %2028 = vst [vmem:[%s276_s13] sm:$0xff] %v2027_v47 }
 0xa02   : > { %2835 = shalt.err (!%p2832_p2)
}
 0xa03   : > { %s2836_s27 = scalar_lea.hbm %s4052_s11, 128  ;;  %s2840_s26 = scalar_lea.hbm %s4103_s5, 256 }
 0xa04   : > { %p2837_p4 = scmp.ne.s32.totalorder %s4052_s11, %s2836_s27  ;;  %p2841_p10 = scmp.lt.u32.totalorder %s4052_s11, %s4103_s5 }
 0xa05   : > { %p2842_p13 = scmp.lt.u32.totalorder %s2840_s26, %s2836_s27  ;;  %p2844_p7 = scmp.lt.u32.totalorder %s2836_s27, %s4052_s11 }
 0xa06   : > { %p2838_p6 = pnand %p2837_p4, %p3037_p12 }
 0xa07   : > { %p2843_p3 = por %p2842_p13, %p2841_p10 }
 0xa08   : > { %p2839_p8 = pneg %p2838_p6 }
 0xa09   : > { %p2845_p9 = por %p2844_p7, %p2843_p3 }
 0xa0b   : > { %p2846_p1 = pnand %p2845_p9, %p2839_p8 }
 0xa0d   : > { %2849 = shalt.err (!%p2846_p1)
}
 0xa0e   : > { %2624 = dma.vmem_to_hbm [thread:$0]  (%p3037_p12), %s4054_s28, 128, %s4052_s11, %s3950_s7  }
 0xa0f PF: > { %s2098_s17 = sand.u32 1, %s2884_s18   ;;  %p4160_p0 = scmp.ne.s32.totalorder %s4124_s25, 0 }
 0xa10   : > { %p4161_p5 = scmp.ge.s32.totalorder %s2896_s21, 2  ;;  %s2099_s8 = scalar_lea.sflag [#allocation4], %s2098_s17 }
 0xa12   : > { %p2637_p11 = pnand %p4161_p5, %p4160_p0 }
 0xa14   : > { %2875 = dma.done.wait (!%p2637_p11), %s2099_s8, 2048  }
 0xa15   : > { %2877 = vsyncadd (!%p2637_p11), %s2099_s8, 4294965248  ;;  %s2107_s29 = sand.u32 1, %s2227_s23  }
 0xa16   : > { %s2108_s22 = scalar_lea.sflag [#allocation9], %s2107_s29 }
 0xa17   : > { %2879 = dma.done.wait (!%p2637_p11), %s2108_s22, 640  }
 0xa18   : > { %2881 = vsyncadd (!%p2637_p11), %s2108_s22, 4294966656  ;;  %p23_p12 = scmp.ge.s32.totalorder %s2999_s30, 4   ;;  %s4162_s18 = smov %s2888_s19 }
 0xa19   : > { %s4163_s19 = smov %s2892_s20  ;;  %s4164_s20 = smov %s3033_s9 }
 0xa1a   : > { %s4165_s21 = smov %s2999_s30  ;;  %25 = sbr.rel (!%p23_p12) target bundleno = 8 (0x8), region = 116 }
 0xa21   :  { %2122 = vsyncpa [#allocation3], 1 }
 0xa22   :  { %2124 = vsyncpa [#allocation3 + $0x1], 1 }
 0xa23   :  { %2125 = vsyncpa [#allocation6], 1 }
 0xa24   :  { %2126 = vsyncpa [#allocation4], 1 }
 0xa25   :  { %2128 = vsyncpa [#allocation4 + $0x1], 1 }
 0xa26   :  { %2129 = vsyncpa [#allocation9], 1 }
 0xa27   :  { %2131 = vsyncpa [#allocation9 + $0x1], 1 }

</bundles_post_ra>
